<compile_context>
chip_gen: v7x
topology: tpu7x:2x2x1
jax: 0.10.0
libtpu: 0.0.40
codegen_flags: <defaults>
</compile_context>

<pallas_src>
import functools

import jax
import jax.numpy as jnp
from jax import lax
from jax.experimental import pallas as pl
from jax.experimental.pallas import tpu as pltpu


def _round_up(x, m):
    return (x + m - 1) // m * m


def _gru_chunk_kernel(gi_ref, wh_ref, bh_ref, h0_ref, out_ref, h_sc, *, hp, chunk):
    """Run `chunk` GRU timesteps per grid step.

    gi_ref : VMEM (chunk, 3*hp) f32 -- hoisted input projections x@W_ih^T + b_ih,
                                       gate column blocks [r | z | n_x]
    wh_ref : VMEM (hp, 3*hp) f32    -- recurrent weights, column blocks [r | z | n_h]
    bh_ref : VMEM (1, 3*hp) f32     -- recurrent biases   [b_hr | b_hz | b_hn]
    h0_ref : VMEM (1, hp) f32       -- initial hidden state
    out_ref: VMEM (chunk, hp) f32   -- hidden state after every timestep in chunk
    h_sc   : VMEM (1, hp) f32       -- hidden state carried across grid steps
    """
    @pl.when(pl.program_id(0) == 0)
    def _():
        h_sc[...] = h0_ref[...]

    wh = wh_ref[...]
    bh = bh_ref[...]

    def step(c, h):
        gi = gi_ref[pl.ds(c, 1), :]                                   # (1, 3*hp)
        # Recurrent GEMV kept in f32 -> no per-step bf16 re-quantization of h.
        gh = jnp.dot(h, wh, preferred_element_type=jnp.float32) + bh  # (1, 3*hp)
        # PyTorch GRU cell, gate order [r, z, n]:
        #   r = sig(gi_r + gh_r); z = sig(gi_z + gh_z); n = tanh(gi_n + r*gh_n)
        r = jax.nn.sigmoid(gi[:, 0:hp] + gh[:, 0:hp])
        z = jax.nn.sigmoid(gi[:, hp:2 * hp] + gh[:, hp:2 * hp])
        n = jnp.tanh(gi[:, 2 * hp:3 * hp] + r * gh[:, 2 * hp:3 * hp])
        h_new = (1.0 - z) * n + z * h
        out_ref[pl.ds(c, 1), :] = h_new
        return h_new

    # Unrolled inner time loop over the chunk (short, static trip count).
    h_sc[...] = lax.fori_loop(0, chunk, step, h_sc[...], unroll=True)


def pack_encoder_params(emb_tbl, w_ih, w_hh, b_ih, b_hh):
    """Build the padded kernel layout from PyTorch-style parameters.

    emb_tbl : (V, H) f32   nn.Embedding.weight
    w_ih    : (3H, H) f32  nn.GRU.weight_ih_l0  (gate order [r, z, n])
    w_hh    : (3H, H) f32  nn.GRU.weight_hh_l0
    b_ih    : (3H,)  f32   nn.GRU.bias_ih_l0
    b_hh    : (3H,)  f32   nn.GRU.bias_hh_l0
    """
    V, H = emb_tbl.shape
    HP = max(_round_up(H, 128), 128)  # pad hidden to a full 128-lane vreg

    whr, whz, whn = w_hh[0:H], w_hh[H:2 * H], w_hh[2 * H:3 * H]

    # Recurrent weights for h @ Wh: rows = hidden (padded), columns = gate blocks.
    Wh = jnp.zeros((HP, 3 * HP), jnp.float32)
    Wh = Wh.at[0:H, 0 * HP:0 * HP + H].set(whr.T)
    Wh = Wh.at[0:H, 1 * HP:1 * HP + H].set(whz.T)
    Wh = Wh.at[0:H, 2 * HP:2 * HP + H].set(whn.T)

    bh = jnp.zeros((1, 3 * HP), jnp.float32)
    bh = bh.at[0, 0 * HP:0 * HP + H].set(b_hh[0:H])
    bh = bh.at[0, 1 * HP:1 * HP + H].set(b_hh[H:2 * H])
    bh = bh.at[0, 2 * HP:2 * HP + H].set(b_hh[2 * H:3 * H])

    return dict(emb=emb_tbl, w_ih=w_ih, b_ih=b_ih, wh=Wh, bh=bh, H=H, HP=HP)


def encoder_rnn_forward(tokens, hidden, packed, *, chunk=8):
    """Fused EncoderRNN forward over a token sequence.

    Equivalent to calling EncoderRNN.forward(token_t, hidden) for each token in
    `tokens`, threading the hidden state through.  For len(tokens) == 1 this is
    exactly the PyTorch module's forward.

    tokens : (T,) int32
    hidden : (1, 1, H) f32
    returns (outputs (1, T, H) f32, hidden_new (1, 1, H) f32)
    """
    emb, w_ih, b_ih = packed["emb"], packed["w_ih"], packed["b_ih"]
    wh, bh = packed["wh"], packed["bh"]
    H, HP = packed["H"], packed["HP"]
    T = int(tokens.shape[0])
    T_pad = _round_up(max(T, 1), chunk)

    toks = jnp.asarray(tokens, jnp.int32)
    # TODO(synk): out-of-range token ids are clamped by the XLA gather instead
    # of raising like nn.Embedding; callers must pass valid ids.

    # Hoisted work (off the serial recurrence chain): embedding gather + one
    # batched input-projection matmul for all timesteps.
    x = jnp.take(emb, toks, axis=0)                                   # (T, H)
    gi = jnp.dot(x, w_ih.T, precision=lax.Precision.HIGHEST) + b_ih   # (T, 3H)

    # Pad to (T_pad, 3*HP) with each gate in its own 128-lane block.
    gi_p = jnp.zeros((T_pad, 3 * HP), jnp.float32)
    gi_p = gi_p.at[:T, 0 * HP:0 * HP + H].set(gi[:, 0:H])
    gi_p = gi_p.at[:T, 1 * HP:1 * HP + H].set(gi[:, H:2 * H])
    gi_p = gi_p.at[:T, 2 * HP:2 * HP + H].set(gi[:, 2 * H:3 * H])

    h0 = jnp.zeros((1, HP), jnp.float32).at[:, :H].set(
        hidden.reshape(1, H).astype(jnp.float32))

    kernel = functools.partial(_gru_chunk_kernel, hp=HP, chunk=chunk)

    outs = pl.pallas_call(
        kernel,
        out_shape=jax.ShapeDtypeStruct((T_pad, HP), jnp.float32),
        grid_spec=pltpu.PrefetchScalarGridSpec(
            num_scalar_prefetch=0,
            grid=(T_pad // chunk,),
            in_specs=[
                # One (chunk, 3HP) slab of hoisted input projections per step.
                pl.BlockSpec((chunk, 3 * HP), lambda i: (i, 0)),
                # Recurrent weights / biases / h0: constant index_map -> DMA'd
                # once, VMEM-resident for the whole sequence.
                pl.BlockSpec((HP, 3 * HP), lambda i: (0, 0)),
                pl.BlockSpec((1, 3 * HP), lambda i: (0, 0)),
                pl.BlockSpec((1, HP), lambda i: (0, 0)),
            ],
            out_specs=pl.BlockSpec((chunk, HP), lambda i: (i, 0)),
            scratch_shapes=[pltpu.VMEM((1, HP), jnp.float32)],
        ),
        compiler_params=pltpu.CompilerParams(
            dimension_semantics=("arbitrary",)),  # recurrence -> sequential axis
    )(gi_p, wh, bh, h0)

    outputs = outs[:T, :H].reshape(1, T, H)
    hidden_new = outputs[:, -1, :].reshape(1, 1, H)
    return outputs, hidden_new


def encoder_rnn_reference_f32(tokens, hidden, raw_params):
    """PyTorch-exact GRU math in f32 on the unfused params."""
    emb_tbl, w_ih, w_hh, b_ih, b_hh = raw_params
    H = emb_tbl.shape[1]
    h = hidden.reshape(1, H).astype(jnp.float32)
    outs = []
    for t in range(int(tokens.shape[0])):
        x = emb_tbl[tokens[t]].reshape(1, H)
        gi = jnp.dot(x, w_ih.T, precision=lax.Precision.HIGHEST) + b_ih
        gh = jnp.dot(h, w_hh.T, precision=lax.Precision.HIGHEST) + b_hh
        r = jax.nn.sigmoid(gi[:, 0:H] + gh[:, 0:H])
        z = jax.nn.sigmoid(gi[:, H:2 * H] + gh[:, H:2 * H])
        n = jnp.tanh(gi[:, 2 * H:3 * H] + r * gh[:, 2 * H:3 * H])
        h = (1.0 - z) * n + z * h
        outs.append(h)
    outputs = jnp.stack(outs, axis=0).reshape(1, -1, H)
    return outputs, h.reshape(1, 1, H)


if __name__ == "__main__":
    VOCAB = 16
    HIDDEN = 32
    SEQ = 12          # not a multiple of the chunk -> exercises padding path

    key = jax.random.PRNGKey(0)
    k_emb, k_wi, k_wh, k_bi, k_bh, k_tok = jax.random.split(key, 6)
    bound = 1.0 / jnp.sqrt(HIDDEN)
    emb_tbl = jax.random.normal(k_emb, (VOCAB, HIDDEN), jnp.float32)
    w_ih = jax.random.uniform(k_wi, (3 * HIDDEN, HIDDEN), jnp.float32, -bound, bound)
    w_hh = jax.random.uniform(k_wh, (3 * HIDDEN, HIDDEN), jnp.float32, -bound, bound)
    b_ih = jax.random.uniform(k_bi, (3 * HIDDEN,), jnp.float32, -bound, bound)
    b_hh = jax.random.uniform(k_bh, (3 * HIDDEN,), jnp.float32, -bound, bound)
    raw_params = (emb_tbl, w_ih, w_hh, b_ih, b_hh)

    packed = pack_encoder_params(*raw_params)

    tokens = jax.random.randint(k_tok, (SEQ,), 0, VOCAB, dtype=jnp.int32)
    hidden0 = jnp.zeros((1, 1, HIDDEN), jnp.float32)  # EncoderRNN.initHidden()

    out, h_new = encoder_rnn_forward(tokens, hidden0, packed, chunk=8)
    out = jax.block_until_ready(out)
    h_new = jax.block_until_ready(h_new)

    assert out.shape == (1, SEQ, HIDDEN)
    assert h_new.shape == (1, 1, HIDDEN)

    # Check against exact f32 PyTorch GRU math (all math is now f32 end to end;
    # tolerance only covers MXU-vs-XLA accumulation-order differences).
    out_f, h_f = encoder_rnn_reference_f32(tokens, hidden0, raw_params)
    assert jnp.allclose(out, out_f, atol=5e-3, rtol=5e-3), (
        float(jnp.max(jnp.abs(out - out_f))))
    assert jnp.allclose(h_new, h_f, atol=5e-3, rtol=5e-3), (
        float(jnp.max(jnp.abs(h_new - h_f))))

    print("KERNEL_OK")
</pallas_src>

<mosaic_0001>
module attributes {stable_mosaic.version = 11 : i64} {
  func.func @_gru_chunk_kernel(%arg0: i32, %arg1: memref<8x384xf32, #tpu.memory_space<vmem>>, %arg2: memref<128x384xf32, #tpu.memory_space<vmem>>, %arg3: memref<1x384xf32, #tpu.memory_space<vmem>>, %arg4: memref<1x128xf32, #tpu.memory_space<vmem>>, %arg5: memref<8x128xf32, #tpu.memory_space<vmem>>, %arg6: memref<1x128xf32, #tpu.memory_space<vmem>>) attributes {dimension_semantics = [#tpu.dimension_semantics<arbitrary>], iteration_bounds = array<i64: 2>, scalar_prefetch = 0 : i64, scratch_operands = 1 : i64, tpu.core_type = #tpu.core_type<tc>, window_params = [{transform_indices = @transform_0, window_bounds = array<i64: 8, 384>}, {pipeline_mode = #tpu.pipeline_mode<synchronous>, transform_indices = @transform_1, window_bounds = array<i64: 128, 384>}, {pipeline_mode = #tpu.pipeline_mode<synchronous>, transform_indices = @transform_2, window_bounds = array<i64: 1, 384>}, {pipeline_mode = #tpu.pipeline_mode<synchronous>, transform_indices = @transform_3, window_bounds = array<i64: 1, 128>}, {transform_indices = @transform_4, window_bounds = array<i64: 8, 128>}]} {
    %c0_i32 = arith.constant 0 : i32
    %0 = arith.cmpi eq, %arg0, %c0_i32 : i32
    %1 = arith.extui %0 : i1 to i32
    %c0_i32_0 = arith.constant 0 : i32
    %2 = arith.cmpi ne, %1, %c0_i32_0 : i32
    scf.if %2 {
      %c0_56 = arith.constant 0 : index
      %c0_57 = arith.constant 0 : index
      %263 = vector.load %arg4[%c0_56, %c0_57] : memref<1x128xf32, #tpu.memory_space<vmem>>, vector<1x128xf32>
      %c0_58 = arith.constant 0 : index
      %c0_59 = arith.constant 0 : index
      %264 = vector.load %arg6[%c0_58, %c0_59] : memref<1x128xf32, #tpu.memory_space<vmem>>, vector<1x128xf32>
      tpu.vector_store %arg6[%c0_58, %c0_59], %263 {strides = array<i32>} : memref<1x128xf32, #tpu.memory_space<vmem>>, vector<1x128xf32>,
    } else {
    }
    %c0 = arith.constant 0 : index
    %c0_1 = arith.constant 0 : index
    %3 = vector.load %arg2[%c0, %c0_1] : memref<128x384xf32, #tpu.memory_space<vmem>>, vector<128x384xf32>
    %c0_2 = arith.constant 0 : index
    %c0_3 = arith.constant 0 : index
    %4 = vector.load %arg3[%c0_2, %c0_3] : memref<1x384xf32, #tpu.memory_space<vmem>>, vector<1x384xf32>
    %c0_4 = arith.constant 0 : index
    %c0_5 = arith.constant 0 : index
    %5 = vector.load %arg6[%c0_4, %c0_5] : memref<1x128xf32, #tpu.memory_space<vmem>>, vector<1x128xf32>
    %c0_i32_6 = arith.constant 0 : i32
    %6 = arith.index_cast %c0_i32_6 : i32 to index
    %c0_7 = arith.constant 0 : index
    %7 = vector.load %arg1[%6, %c0_7] : memref<8x384xf32, #tpu.memory_space<vmem>>, vector<1x384xf32>
    %cst = arith.constant dense<0.000000e+00> : vector<1x384xf32>
    %8 = tpu.matmul %5, %3, %cst {dimension_numbers = #tpu.dot_dimension_numbers<[1], [0], [0], [1], [0, 0, 1, 1], [], []>} : vector<1x128xf32>, vector<128x384xf32>, vector<1x384xf32> -> vector<1x384xf32>
    %9 = arith.addf %8, %4 : vector<1x384xf32>
    %10 = vector.extract_strided_slice %7 {offsets = [0, 0], sizes = [1, 128], strides = [1, 1]} : vector<1x384xf32> to vector<1x128xf32>
    %11 = vector.extract_strided_slice %9 {offsets = [0, 0], sizes = [1, 128], strides = [1, 1]} : vector<1x384xf32> to vector<1x128xf32>
    %12 = arith.addf %10, %11 : vector<1x128xf32>
    %13 = arith.negf %12 : vector<1x128xf32>
    %14 = math.exp %13 : vector<1x128xf32>
    %cst_8 = arith.constant 1.000000e+00 : f32
    %15 = vector.broadcast %cst_8 : f32 to vector<1x128xf32>
    %16 = arith.addf %15, %14 : vector<1x128xf32>
    %17 = arith.divf %15, %16 : vector<1x128xf32>
    %18 = vector.extract_strided_slice %7 {offsets = [0, 128], sizes = [1, 128], strides = [1, 1]} : vector<1x384xf32> to vector<1x128xf32>
    %19 = vector.extract_strided_slice %9 {offsets = [0, 128], sizes = [1, 128], strides = [1, 1]} : vector<1x384xf32> to vector<1x128xf32>
    %20 = arith.addf %18, %19 : vector<1x128xf32>
    %21 = arith.negf %20 : vector<1x128xf32>
    %22 = math.exp %21 : vector<1x128xf32>
    %cst_9 = arith.constant 1.000000e+00 : f32
    %23 = vector.broadcast %cst_9 : f32 to vector<1x128xf32>
    %24 = arith.addf %23, %22 : vector<1x128xf32>
    %25 = arith.divf %23, %24 : vector<1x128xf32>
    %26 = vector.extract_strided_slice %7 {offsets = [0, 256], sizes = [1, 128], strides = [1, 1]} : vector<1x384xf32> to vector<1x128xf32>
    %27 = vector.extract_strided_slice %9 {offsets = [0, 256], sizes = [1, 128], strides = [1, 1]} : vector<1x384xf32> to vector<1x128xf32>
    %28 = arith.mulf %17, %27 : vector<1x128xf32>
    %29 = arith.addf %26, %28 : vector<1x128xf32>
    %30 = math.tanh %29 : vector<1x128xf32>
    %cst_10 = arith.constant 1.000000e+00 : f32
    %31 = vector.broadcast %cst_10 : f32 to vector<1x128xf32>
    %32 = arith.subf %31, %25 : vector<1x128xf32>
    %33 = arith.mulf %32, %30 : vector<1x128xf32>
    %34 = arith.mulf %25, %5 : vector<1x128xf32>
    %35 = arith.addf %33, %34 : vector<1x128xf32>
    %36 = arith.index_cast %c0_i32_6 : i32 to index
    %c0_11 = arith.constant 0 : index
    %37 = vector.load %arg5[%36, %c0_11] : memref<8x128xf32, #tpu.memory_space<vmem>>, vector<1x128xf32>
    tpu.vector_store %arg5[%36, %c0_11], %35 {strides = array<i32>} : memref<8x128xf32, #tpu.memory_space<vmem>>, vector<1x128xf32>,
    %c1_i32 = arith.constant 1 : i32
    %38 = arith.index_cast %c1_i32 : i32 to index
    %c0_12 = arith.constant 0 : index
    %39 = vector.load %arg1[%38, %c0_12] : memref<8x384xf32, #tpu.memory_space<vmem>>, vector<1x384xf32>
    %cst_13 = arith.constant dense<0.000000e+00> : vector<1x384xf32>
    %40 = tpu.matmul %35, %3, %cst_13 {dimension_numbers = #tpu.dot_dimension_numbers<[1], [0], [0], [1], [0, 0, 1, 1], [], []>} : vector<1x128xf32>, vector<128x384xf32>, vector<1x384xf32> -> vector<1x384xf32>
    %41 = arith.addf %40, %4 : vector<1x384xf32>
    %42 = vector.extract_strided_slice %39 {offsets = [0, 0], sizes = [1, 128], strides = [1, 1]} : vector<1x384xf32> to vector<1x128xf32>
    %43 = vector.extract_strided_slice %41 {offsets = [0, 0], sizes = [1, 128], strides = [1, 1]} : vector<1x384xf32> to vector<1x128xf32>
    %44 = arith.addf %42, %43 : vector<1x128xf32>
    %45 = arith.negf %44 : vector<1x128xf32>
    %46 = math.exp %45 : vector<1x128xf32>
    %cst_14 = arith.constant 1.000000e+00 : f32
    %47 = vector.broadcast %cst_14 : f32 to vector<1x128xf32>
    %48 = arith.addf %47, %46 : vector<1x128xf32>
    %49 = arith.divf %47, %48 : vector<1x128xf32>
    %50 = vector.extract_strided_slice %39 {offsets = [0, 128], sizes = [1, 128], strides = [1, 1]} : vector<1x384xf32> to vector<1x128xf32>
    %51 = vector.extract_strided_slice %41 {offsets = [0, 128], sizes = [1, 128], strides = [1, 1]} : vector<1x384xf32> to vector<1x128xf32>
    %52 = arith.addf %50, %51 : vector<1x128xf32>
    %53 = arith.negf %52 : vector<1x128xf32>
    %54 = math.exp %53 : vector<1x128xf32>
    %cst_15 = arith.constant 1.000000e+00 : f32
    %55 = vector.broadcast %cst_15 : f32 to vector<1x128xf32>
    %56 = arith.addf %55, %54 : vector<1x128xf32>
    %57 = arith.divf %55, %56 : vector<1x128xf32>
    %58 = vector.extract_strided_slice %39 {offsets = [0, 256], sizes = [1, 128], strides = [1, 1]} : vector<1x384xf32> to vector<1x128xf32>
    %59 = vector.extract_strided_slice %41 {offsets = [0, 256], sizes = [1, 128], strides = [1, 1]} : vector<1x384xf32> to vector<1x128xf32>
    %60 = arith.mulf %49, %59 : vector<1x128xf32>
    %61 = arith.addf %58, %60 : vector<1x128xf32>
    %62 = math.tanh %61 : vector<1x128xf32>
    %cst_16 = arith.constant 1.000000e+00 : f32
    %63 = vector.broadcast %cst_16 : f32 to vector<1x128xf32>
    %64 = arith.subf %63, %57 : vector<1x128xf32>
    %65 = arith.mulf %64, %62 : vector<1x128xf32>
    %66 = arith.mulf %57, %35 : vector<1x128xf32>
    %67 = arith.addf %65, %66 : vector<1x128xf32>
    %68 = arith.index_cast %c1_i32 : i32 to index
    %c0_17 = arith.constant 0 : index
    %69 = vector.load %arg5[%68, %c0_17] : memref<8x128xf32, #tpu.memory_space<vmem>>, vector<1x128xf32>
    tpu.vector_store %arg5[%68, %c0_17], %67 {strides = array<i32>} : memref<8x128xf32, #tpu.memory_space<vmem>>, vector<1x128xf32>,
    %c2_i32 = arith.constant 2 : i32
    %70 = arith.index_cast %c2_i32 : i32 to index
    %c0_18 = arith.constant 0 : index
    %71 = vector.load %arg1[%70, %c0_18] : memref<8x384xf32, #tpu.memory_space<vmem>>, vector<1x384xf32>
    %cst_19 = arith.constant dense<0.000000e+00> : vector<1x384xf32>
    %72 = tpu.matmul %67, %3, %cst_19 {dimension_numbers = #tpu.dot_dimension_numbers<[1], [0], [0], [1], [0, 0, 1, 1], [], []>} : vector<1x128xf32>, vector<128x384xf32>, vector<1x384xf32> -> vector<1x384xf32>
    %73 = arith.addf %72, %4 : vector<1x384xf32>
    %74 = vector.extract_strided_slice %71 {offsets = [0, 0], sizes = [1, 128], strides = [1, 1]} : vector<1x384xf32> to vector<1x128xf32>
    %75 = vector.extract_strided_slice %73 {offsets = [0, 0], sizes = [1, 128], strides = [1, 1]} : vector<1x384xf32> to vector<1x128xf32>
    %76 = arith.addf %74, %75 : vector<1x128xf32>
    %77 = arith.negf %76 : vector<1x128xf32>
    %78 = math.exp %77 : vector<1x128xf32>
    %cst_20 = arith.constant 1.000000e+00 : f32
    %79 = vector.broadcast %cst_20 : f32 to vector<1x128xf32>
    %80 = arith.addf %79, %78 : vector<1x128xf32>
    %81 = arith.divf %79, %80 : vector<1x128xf32>
    %82 = vector.extract_strided_slice %71 {offsets = [0, 128], sizes = [1, 128], strides = [1, 1]} : vector<1x384xf32> to vector<1x128xf32>
    %83 = vector.extract_strided_slice %73 {offsets = [0, 128], sizes = [1, 128], strides = [1, 1]} : vector<1x384xf32> to vector<1x128xf32>
    %84 = arith.addf %82, %83 : vector<1x128xf32>
    %85 = arith.negf %84 : vector<1x128xf32>
    %86 = math.exp %85 : vector<1x128xf32>
    %cst_21 = arith.constant 1.000000e+00 : f32
    %87 = vector.broadcast %cst_21 : f32 to vector<1x128xf32>
    %88 = arith.addf %87, %86 : vector<1x128xf32>
    %89 = arith.divf %87, %88 : vector<1x128xf32>
    %90 = vector.extract_strided_slice %71 {offsets = [0, 256], sizes = [1, 128], strides = [1, 1]} : vector<1x384xf32> to vector<1x128xf32>
    %91 = vector.extract_strided_slice %73 {offsets = [0, 256], sizes = [1, 128], strides = [1, 1]} : vector<1x384xf32> to vector<1x128xf32>
    %92 = arith.mulf %81, %91 : vector<1x128xf32>
    %93 = arith.addf %90, %92 : vector<1x128xf32>
    %94 = math.tanh %93 : vector<1x128xf32>
    %cst_22 = arith.constant 1.000000e+00 : f32
    %95 = vector.broadcast %cst_22 : f32 to vector<1x128xf32>
    %96 = arith.subf %95, %89 : vector<1x128xf32>
    %97 = arith.mulf %96, %94 : vector<1x128xf32>
    %98 = arith.mulf %89, %67 : vector<1x128xf32>
    %99 = arith.addf %97, %98 : vector<1x128xf32>
    %100 = arith.index_cast %c2_i32 : i32 to index
    %c0_23 = arith.constant 0 : index
    %101 = vector.load %arg5[%100, %c0_23] : memref<8x128xf32, #tpu.memory_space<vmem>>, vector<1x128xf32>
    tpu.vector_store %arg5[%100, %c0_23], %99 {strides = array<i32>} : memref<8x128xf32, #tpu.memory_space<vmem>>, vector<1x128xf32>,
    %c3_i32 = arith.constant 3 : i32
    %102 = arith.index_cast %c3_i32 : i32 to index
    %c0_24 = arith.constant 0 : index
    %103 = vector.load %arg1[%102, %c0_24] : memref<8x384xf32, #tpu.memory_space<vmem>>, vector<1x384xf32>
    %cst_25 = arith.constant dense<0.000000e+00> : vector<1x384xf32>
    %104 = tpu.matmul %99, %3, %cst_25 {dimension_numbers = #tpu.dot_dimension_numbers<[1], [0], [0], [1], [0, 0, 1, 1], [], []>} : vector<1x128xf32>, vector<128x384xf32>, vector<1x384xf32> -> vector<1x384xf32>
    %105 = arith.addf %104, %4 : vector<1x384xf32>
    %106 = vector.extract_strided_slice %103 {offsets = [0, 0], sizes = [1, 128], strides = [1, 1]} : vector<1x384xf32> to vector<1x128xf32>
    %107 = vector.extract_strided_slice %105 {offsets = [0, 0], sizes = [1, 128], strides = [1, 1]} : vector<1x384xf32> to vector<1x128xf32>
    %108 = arith.addf %106, %107 : vector<1x128xf32>
    %109 = arith.negf %108 : vector<1x128xf32>
    %110 = math.exp %109 : vector<1x128xf32>
    %cst_26 = arith.constant 1.000000e+00 : f32
    %111 = vector.broadcast %cst_26 : f32 to vector<1x128xf32>
    %112 = arith.addf %111, %110 : vector<1x128xf32>
    %113 = arith.divf %111, %112 : vector<1x128xf32>
    %114 = vector.extract_strided_slice %103 {offsets = [0, 128], sizes = [1, 128], strides = [1, 1]} : vector<1x384xf32> to vector<1x128xf32>
    %115 = vector.extract_strided_slice %105 {offsets = [0, 128], sizes = [1, 128], strides = [1, 1]} : vector<1x384xf32> to vector<1x128xf32>
    %116 = arith.addf %114, %115 : vector<1x128xf32>
    %117 = arith.negf %116 : vector<1x128xf32>
    %118 = math.exp %117 : vector<1x128xf32>
    %cst_27 = arith.constant 1.000000e+00 : f32
    %119 = vector.broadcast %cst_27 : f32 to vector<1x128xf32>
    %120 = arith.addf %119, %118 : vector<1x128xf32>
    %121 = arith.divf %119, %120 : vector<1x128xf32>
    %122 = vector.extract_strided_slice %103 {offsets = [0, 256], sizes = [1, 128], strides = [1, 1]} : vector<1x384xf32> to vector<1x128xf32>
    %123 = vector.extract_strided_slice %105 {offsets = [0, 256], sizes = [1, 128], strides = [1, 1]} : vector<1x384xf32> to vector<1x128xf32>
    %124 = arith.mulf %113, %123 : vector<1x128xf32>
    %125 = arith.addf %122, %124 : vector<1x128xf32>
    %126 = math.tanh %125 : vector<1x128xf32>
    %cst_28 = arith.constant 1.000000e+00 : f32
    %127 = vector.broadcast %cst_28 : f32 to vector<1x128xf32>
    %128 = arith.subf %127, %121 : vector<1x128xf32>
    %129 = arith.mulf %128, %126 : vector<1x128xf32>
    %130 = arith.mulf %121, %99 : vector<1x128xf32>
    %131 = arith.addf %129, %130 : vector<1x128xf32>
    %132 = arith.index_cast %c3_i32 : i32 to index
    %c0_29 = arith.constant 0 : index
    %133 = vector.load %arg5[%132, %c0_29] : memref<8x128xf32, #tpu.memory_space<vmem>>, vector<1x128xf32>
    tpu.vector_store %arg5[%132, %c0_29], %131 {strides = array<i32>} : memref<8x128xf32, #tpu.memory_space<vmem>>, vector<1x128xf32>,
    %c4_i32 = arith.constant 4 : i32
    %134 = arith.index_cast %c4_i32 : i32 to index
    %c0_30 = arith.constant 0 : index
    %135 = vector.load %arg1[%134, %c0_30] : memref<8x384xf32, #tpu.memory_space<vmem>>, vector<1x384xf32>
    %cst_31 = arith.constant dense<0.000000e+00> : vector<1x384xf32>
    %136 = tpu.matmul %131, %3, %cst_31 {dimension_numbers = #tpu.dot_dimension_numbers<[1], [0], [0], [1], [0, 0, 1, 1], [], []>} : vector<1x128xf32>, vector<128x384xf32>, vector<1x384xf32> -> vector<1x384xf32>
    %137 = arith.addf %136, %4 : vector<1x384xf32>
    %138 = vector.extract_strided_slice %135 {offsets = [0, 0], sizes = [1, 128], strides = [1, 1]} : vector<1x384xf32> to vector<1x128xf32>
    %139 = vector.extract_strided_slice %137 {offsets = [0, 0], sizes = [1, 128], strides = [1, 1]} : vector<1x384xf32> to vector<1x128xf32>
    %140 = arith.addf %138, %139 : vector<1x128xf32>
    %141 = arith.negf %140 : vector<1x128xf32>
    %142 = math.exp %141 : vector<1x128xf32>
    %cst_32 = arith.constant 1.000000e+00 : f32
    %143 = vector.broadcast %cst_32 : f32 to vector<1x128xf32>
    %144 = arith.addf %143, %142 : vector<1x128xf32>
    %145 = arith.divf %143, %144 : vector<1x128xf32>
    %146 = vector.extract_strided_slice %135 {offsets = [0, 128], sizes = [1, 128], strides = [1, 1]} : vector<1x384xf32> to vector<1x128xf32>
    %147 = vector.extract_strided_slice %137 {offsets = [0, 128], sizes = [1, 128], strides = [1, 1]} : vector<1x384xf32> to vector<1x128xf32>
    %148 = arith.addf %146, %147 : vector<1x128xf32>
    %149 = arith.negf %148 : vector<1x128xf32>
    %150 = math.exp %149 : vector<1x128xf32>
    %cst_33 = arith.constant 1.000000e+00 : f32
    %151 = vector.broadcast %cst_33 : f32 to vector<1x128xf32>
    %152 = arith.addf %151, %150 : vector<1x128xf32>
    %153 = arith.divf %151, %152 : vector<1x128xf32>
    %154 = vector.extract_strided_slice %135 {offsets = [0, 256], sizes = [1, 128], strides = [1, 1]} : vector<1x384xf32> to vector<1x128xf32>
    %155 = vector.extract_strided_slice %137 {offsets = [0, 256], sizes = [1, 128], strides = [1, 1]} : vector<1x384xf32> to vector<1x128xf32>
    %156 = arith.mulf %145, %155 : vector<1x128xf32>
    %157 = arith.addf %154, %156 : vector<1x128xf32>
    %158 = math.tanh %157 : vector<1x128xf32>
    %cst_34 = arith.constant 1.000000e+00 : f32
    %159 = vector.broadcast %cst_34 : f32 to vector<1x128xf32>
    %160 = arith.subf %159, %153 : vector<1x128xf32>
    %161 = arith.mulf %160, %158 : vector<1x128xf32>
    %162 = arith.mulf %153, %131 : vector<1x128xf32>
    %163 = arith.addf %161, %162 : vector<1x128xf32>
    %164 = arith.index_cast %c4_i32 : i32 to index
    %c0_35 = arith.constant 0 : index
    %165 = vector.load %arg5[%164, %c0_35] : memref<8x128xf32, #tpu.memory_space<vmem>>, vector<1x128xf32>
    tpu.vector_store %arg5[%164, %c0_35], %163 {strides = array<i32>} : memref<8x128xf32, #tpu.memory_space<vmem>>, vector<1x128xf32>,
    %c5_i32 = arith.constant 5 : i32
    %166 = arith.index_cast %c5_i32 : i32 to index
    %c0_36 = arith.constant 0 : index
    %167 = vector.load %arg1[%166, %c0_36] : memref<8x384xf32, #tpu.memory_space<vmem>>, vector<1x384xf32>
    %cst_37 = arith.constant dense<0.000000e+00> : vector<1x384xf32>
    %168 = tpu.matmul %163, %3, %cst_37 {dimension_numbers = #tpu.dot_dimension_numbers<[1], [0], [0], [1], [0, 0, 1, 1], [], []>} : vector<1x128xf32>, vector<128x384xf32>, vector<1x384xf32> -> vector<1x384xf32>
    %169 = arith.addf %168, %4 : vector<1x384xf32>
    %170 = vector.extract_strided_slice %167 {offsets = [0, 0], sizes = [1, 128], strides = [1, 1]} : vector<1x384xf32> to vector<1x128xf32>
    %171 = vector.extract_strided_slice %169 {offsets = [0, 0], sizes = [1, 128], strides = [1, 1]} : vector<1x384xf32> to vector<1x128xf32>
    %172 = arith.addf %170, %171 : vector<1x128xf32>
    %173 = arith.negf %172 : vector<1x128xf32>
    %174 = math.exp %173 : vector<1x128xf32>
    %cst_38 = arith.constant 1.000000e+00 : f32
    %175 = vector.broadcast %cst_38 : f32 to vector<1x128xf32>
    %176 = arith.addf %175, %174 : vector<1x128xf32>
    %177 = arith.divf %175, %176 : vector<1x128xf32>
    %178 = vector.extract_strided_slice %167 {offsets = [0, 128], sizes = [1, 128], strides = [1, 1]} : vector<1x384xf32> to vector<1x128xf32>
    %179 = vector.extract_strided_slice %169 {offsets = [0, 128], sizes = [1, 128], strides = [1, 1]} : vector<1x384xf32> to vector<1x128xf32>
    %180 = arith.addf %178, %179 : vector<1x128xf32>
    %181 = arith.negf %180 : vector<1x128xf32>
    %182 = math.exp %181 : vector<1x128xf32>
    %cst_39 = arith.constant 1.000000e+00 : f32
    %183 = vector.broadcast %cst_39 : f32 to vector<1x128xf32>
    %184 = arith.addf %183, %182 : vector<1x128xf32>
    %185 = arith.divf %183, %184 : vector<1x128xf32>
    %186 = vector.extract_strided_slice %167 {offsets = [0, 256], sizes = [1, 128], strides = [1, 1]} : vector<1x384xf32> to vector<1x128xf32>
    %187 = vector.extract_strided_slice %169 {offsets = [0, 256], sizes = [1, 128], strides = [1, 1]} : vector<1x384xf32> to vector<1x128xf32>
    %188 = arith.mulf %177, %187 : vector<1x128xf32>
    %189 = arith.addf %186, %188 : vector<1x128xf32>
    %190 = math.tanh %189 : vector<1x128xf32>
    %cst_40 = arith.constant 1.000000e+00 : f32
    %191 = vector.broadcast %cst_40 : f32 to vector<1x128xf32>
    %192 = arith.subf %191, %185 : vector<1x128xf32>
    %193 = arith.mulf %192, %190 : vector<1x128xf32>
    %194 = arith.mulf %185, %163 : vector<1x128xf32>
    %195 = arith.addf %193, %194 : vector<1x128xf32>
    %196 = arith.index_cast %c5_i32 : i32 to index
    %c0_41 = arith.constant 0 : index
    %197 = vector.load %arg5[%196, %c0_41] : memref<8x128xf32, #tpu.memory_space<vmem>>, vector<1x128xf32>
    tpu.vector_store %arg5[%196, %c0_41], %195 {strides = array<i32>} : memref<8x128xf32, #tpu.memory_space<vmem>>, vector<1x128xf32>,
    %c6_i32 = arith.constant 6 : i32
    %198 = arith.index_cast %c6_i32 : i32 to index
    %c0_42 = arith.constant 0 : index
    %199 = vector.load %arg1[%198, %c0_42] : memref<8x384xf32, #tpu.memory_space<vmem>>, vector<1x384xf32>
    %cst_43 = arith.constant dense<0.000000e+00> : vector<1x384xf32>
    %200 = tpu.matmul %195, %3, %cst_43 {dimension_numbers = #tpu.dot_dimension_numbers<[1], [0], [0], [1], [0, 0, 1, 1], [], []>} : vector<1x128xf32>, vector<128x384xf32>, vector<1x384xf32> -> vector<1x384xf32>
    %201 = arith.addf %200, %4 : vector<1x384xf32>
    %202 = vector.extract_strided_slice %199 {offsets = [0, 0], sizes = [1, 128], strides = [1, 1]} : vector<1x384xf32> to vector<1x128xf32>
    %203 = vector.extract_strided_slice %201 {offsets = [0, 0], sizes = [1, 128], strides = [1, 1]} : vector<1x384xf32> to vector<1x128xf32>
    %204 = arith.addf %202, %203 : vector<1x128xf32>
    %205 = arith.negf %204 : vector<1x128xf32>
    %206 = math.exp %205 : vector<1x128xf32>
    %cst_44 = arith.constant 1.000000e+00 : f32
    %207 = vector.broadcast %cst_44 : f32 to vector<1x128xf32>
    %208 = arith.addf %207, %206 : vector<1x128xf32>
    %209 = arith.divf %207, %208 : vector<1x128xf32>
    %210 = vector.extract_strided_slice %199 {offsets = [0, 128], sizes = [1, 128], strides = [1, 1]} : vector<1x384xf32> to vector<1x128xf32>
    %211 = vector.extract_strided_slice %201 {offsets = [0, 128], sizes = [1, 128], strides = [1, 1]} : vector<1x384xf32> to vector<1x128xf32>
    %212 = arith.addf %210, %211 : vector<1x128xf32>
    %213 = arith.negf %212 : vector<1x128xf32>
    %214 = math.exp %213 : vector<1x128xf32>
    %cst_45 = arith.constant 1.000000e+00 : f32
    %215 = vector.broadcast %cst_45 : f32 to vector<1x128xf32>
    %216 = arith.addf %215, %214 : vector<1x128xf32>
    %217 = arith.divf %215, %216 : vector<1x128xf32>
    %218 = vector.extract_strided_slice %199 {offsets = [0, 256], sizes = [1, 128], strides = [1, 1]} : vector<1x384xf32> to vector<1x128xf32>
    %219 = vector.extract_strided_slice %201 {offsets = [0, 256], sizes = [1, 128], strides = [1, 1]} : vector<1x384xf32> to vector<1x128xf32>
    %220 = arith.mulf %209, %219 : vector<1x128xf32>
    %221 = arith.addf %218, %220 : vector<1x128xf32>
    %222 = math.tanh %221 : vector<1x128xf32>
    %cst_46 = arith.constant 1.000000e+00 : f32
    %223 = vector.broadcast %cst_46 : f32 to vector<1x128xf32>
    %224 = arith.subf %223, %217 : vector<1x128xf32>
    %225 = arith.mulf %224, %222 : vector<1x128xf32>
    %226 = arith.mulf %217, %195 : vector<1x128xf32>
    %227 = arith.addf %225, %226 : vector<1x128xf32>
    %228 = arith.index_cast %c6_i32 : i32 to index
    %c0_47 = arith.constant 0 : index
    %229 = vector.load %arg5[%228, %c0_47] : memref<8x128xf32, #tpu.memory_space<vmem>>, vector<1x128xf32>
    tpu.vector_store %arg5[%228, %c0_47], %227 {strides = array<i32>} : memref<8x128xf32, #tpu.memory_space<vmem>>, vector<1x128xf32>,
    %c7_i32 = arith.constant 7 : i32
    %230 = arith.index_cast %c7_i32 : i32 to index
    %c0_48 = arith.constant 0 : index
    %231 = vector.load %arg1[%230, %c0_48] : memref<8x384xf32, #tpu.memory_space<vmem>>, vector<1x384xf32>
    %cst_49 = arith.constant dense<0.000000e+00> : vector<1x384xf32>
    %232 = tpu.matmul %227, %3, %cst_49 {dimension_numbers = #tpu.dot_dimension_numbers<[1], [0], [0], [1], [0, 0, 1, 1], [], []>} : vector<1x128xf32>, vector<128x384xf32>, vector<1x384xf32> -> vector<1x384xf32>
    %233 = arith.addf %232, %4 : vector<1x384xf32>
    %234 = vector.extract_strided_slice %231 {offsets = [0, 0], sizes = [1, 128], strides = [1, 1]} : vector<1x384xf32> to vector<1x128xf32>
    %235 = vector.extract_strided_slice %233 {offsets = [0, 0], sizes = [1, 128], strides = [1, 1]} : vector<1x384xf32> to vector<1x128xf32>
    %236 = arith.addf %234, %235 : vector<1x128xf32>
    %237 = arith.negf %236 : vector<1x128xf32>
    %238 = math.exp %237 : vector<1x128xf32>
    %cst_50 = arith.constant 1.000000e+00 : f32
    %239 = vector.broadcast %cst_50 : f32 to vector<1x128xf32>
    %240 = arith.addf %239, %238 : vector<1x128xf32>
    %241 = arith.divf %239, %240 : vector<1x128xf32>
    %242 = vector.extract_strided_slice %231 {offsets = [0, 128], sizes = [1, 128], strides = [1, 1]} : vector<1x384xf32> to vector<1x128xf32>
    %243 = vector.extract_strided_slice %233 {offsets = [0, 128], sizes = [1, 128], strides = [1, 1]} : vector<1x384xf32> to vector<1x128xf32>
    %244 = arith.addf %242, %243 : vector<1x128xf32>
    %245 = arith.negf %244 : vector<1x128xf32>
    %246 = math.exp %245 : vector<1x128xf32>
    %cst_51 = arith.constant 1.000000e+00 : f32
    %247 = vector.broadcast %cst_51 : f32 to vector<1x128xf32>
    %248 = arith.addf %247, %246 : vector<1x128xf32>
    %249 = arith.divf %247, %248 : vector<1x128xf32>
    %250 = vector.extract_strided_slice %231 {offsets = [0, 256], sizes = [1, 128], strides = [1, 1]} : vector<1x384xf32> to vector<1x128xf32>
    %251 = vector.extract_strided_slice %233 {offsets = [0, 256], sizes = [1, 128], strides = [1, 1]} : vector<1x384xf32> to vector<1x128xf32>
    %252 = arith.mulf %241, %251 : vector<1x128xf32>
    %253 = arith.addf %250, %252 : vector<1x128xf32>
    %254 = math.tanh %253 : vector<1x128xf32>
    %cst_52 = arith.constant 1.000000e+00 : f32
    %255 = vector.broadcast %cst_52 : f32 to vector<1x128xf32>
    %256 = arith.subf %255, %249 : vector<1x128xf32>
    %257 = arith.mulf %256, %254 : vector<1x128xf32>
    %258 = arith.mulf %249, %227 : vector<1x128xf32>
    %259 = arith.addf %257, %258 : vector<1x128xf32>
    %260 = arith.index_cast %c7_i32 : i32 to index
    %c0_53 = arith.constant 0 : index
    %261 = vector.load %arg5[%260, %c0_53] : memref<8x128xf32, #tpu.memory_space<vmem>>, vector<1x128xf32>
    tpu.vector_store %arg5[%260, %c0_53], %259 {strides = array<i32>} : memref<8x128xf32, #tpu.memory_space<vmem>>, vector<1x128xf32>,
    %c8_i32 = arith.constant 8 : i32
    %c0_54 = arith.constant 0 : index
    %c0_55 = arith.constant 0 : index
    %262 = vector.load %arg6[%c0_54, %c0_55] : memref<1x128xf32, #tpu.memory_space<vmem>>, vector<1x128xf32>
    tpu.vector_store %arg6[%c0_54, %c0_55], %259 {strides = array<i32>} : memref<1x128xf32, #tpu.memory_space<vmem>>, vector<1x128xf32>,
    return
  }
  func.func @transform_0(%arg0: i32) -> (i32, i32) {
    %c0_i32 = arith.constant 0 : i32
    %c0_i32_0 = arith.constant 0 : i32
    return %arg0, %c0_i32 : i32, i32
  }
  func.func @transform_1(%arg0: i32) -> (i32, i32) {
    %c0_i32 = arith.constant 0 : i32
    %c0_i32_0 = arith.constant 0 : i32
    %c0_i32_1 = arith.constant 0 : i32
    return %c0_i32, %c0_i32_0 : i32, i32
  }
  func.func @transform_2(%arg0: i32) -> (i32, i32) {
    %c0_i32 = arith.constant 0 : i32
    %c0_i32_0 = arith.constant 0 : i32
    %c0_i32_1 = arith.constant 0 : i32
    return %c0_i32, %c0_i32_0 : i32, i32
  }
  func.func @transform_3(%arg0: i32) -> (i32, i32) {
    %c0_i32 = arith.constant 0 : i32
    %c0_i32_0 = arith.constant 0 : i32
    %c0_i32_1 = arith.constant 0 : i32
    return %c0_i32, %c0_i32_0 : i32, i32
  }
  func.func @transform_4(%arg0: i32) -> (i32, i32) {
    %c0_i32 = arith.constant 0 : i32
    %c0_i32_0 = arith.constant 0 : i32
    return %arg0, %c0_i32 : i32, i32
  }
}

</mosaic_0001>

<bundles_post_ra>
// kernel: tpu_custom_call.1
= control target key start
LH: loop header
LB: loop body
LE: loop exit
PB: predicated region body
PF: predicated region fallthrough
CT: control target
= control target key end

     0   :  { %9 = vsyncpa [#allocation4], 0  ;;  %s3589_s0 = inlined_call_operand.hbm [shape: f32[16,384], index: 0, kind: input, shape index: {}]   ;;  %s3590_s1 = inlined_call_operand.hbm [shape: f32[128,384], index: 1, kind: input, shape index: {}]   ;;  %s3591_s2 = inlined_call_operand.vmem [shape: f32[1,384], index: 2, kind: input, shape index: {}]   ;;  %s3592_s3 = inlined_call_operand.vmem [shape: f32[1,128], index: 3, kind: input, shape index: {}]   ;;  %s3593_s4 = inlined_call_operand.hbm [shape: f32[16,128], index: 4, kind: output, shape index: {}]  }
   0x1   :  { %11 = vsyncpa [#allocation4 + $0x1], 0 }
   0x2   :  { %12 = vsyncpa [#allocation7], 0 }
   0x3   :  { %13 = vsyncpa [#allocation5], 0 }
   0x4   :  { %15 = vsyncpa [#allocation5 + $0x1], 0  ;;  %s2963_s15 = smov 0   ;;  %s2965_s16 = smov 0  }
   0x5   :  { %s2967_s17 = smov 0   ;;  %s2969_s18 = smov 0  }
   0x6 LB: > { %s2984_s19 = sadd.s32 4294967295, %s2928_s18   ;;  %s1755_s20 = sadd.s32 4294967294, %s2928_s18   ;;  %s2928_s18 = sphi %s2969_s18, %s3614_s18   ;;  %s2924_s17 = sphi %s2967_s17, %s3613_s17   ;;  %s2920_s16 = sphi %s2965_s16, %s3612_s16   ;;  %s2916_s15 = sphi %s2963_s15, %s3611_s15  }
   0x7   : > { %p41_p0 = scmp.ne.s32.totalorder %s2920_s16, %s2916_s15  ;;  %p3594_p1 = scmp.eq.s32.totalorder %s2984_s19, 0 }
   0x8   : > { %p134_p3 = scmp.eq.s32.totalorder %s1755_s20, 1  ;;  %p1756_p5 = scmp.ge.s32.totalorder %s2928_s18, 1 }
   0x9   : > { %p2993_p4 = por %p3594_p1, %p41_p0  ;;  %p141_p7 = scmp.lt.s32.totalorder %s2928_s18, 3 }
   0xa   : > { %p2998_p6 = por %p134_p3, %p41_p0  ;;  %s2930_s24 = smov [#allocation6]  }
   0xb   : > { %s3597_s21 = scalar_select %p2993_p4, 1, 0 }
   0xc   : > { %s3598_s22 = scalar_select %p2998_p6, 1, 0 }
   0xd   : > { %p3004_p9 = pnand %p1756_p5, %p141_p7  ;;  %s153_s25 = sshll.u32 %s2930_s24, 4  ;;  %s3008_s25 = int_to_ptr.vmem [resolvable:$true] %s153_s25 }
   0xe   : > { %s3020_s27 = sadd.s32 1, %s2928_s18   ;;  %s28_s28 = sadd.s32 1, %s2924_s17 }
   0xf   : > { %s3599_s23 = scalar_select %p3004_p9, 1, 0 }
  0x10   : > { %p2666_p10 = pneg %p3004_p9  ;;  %s25_s29 = ssub.s32 %s2928_s18, %s3020_s27 }
  0x11   : > { %s2800_s6 = scalar_lea.hbm %s3590_s1, 6144 }
  0x12   : > { %p3015_p12 = pnand %p2666_p10, %p3594_p1  ;;  %p2801_p13 = scmp.ne.s32.totalorder %s3590_s1, %s2800_s6 }
  0x13   : > { %p2807_p7 = scmp.lt.u32.totalorder %s2800_s6, %s3590_s1 }
  0x14   : > { %p2802_p0 = pneg %p3015_p12 }
  0x16   : > { %p2803_p3 = pnand %p2802_p0, %p2801_p13 }
  0x18   : > { %p2804_p5 = pneg %p2803_p3 }
  0x1a   : > { %p2809_p10 = pnand %p2807_p7, %p2804_p5 }
  0x1c   : > { %2812 = shalt.err (!%p2809_p10)
}
  0x1d   : > { %s2813_s11 = scalar_lea.vmem %s3008_s25, 6144  ;;  %p2821_p2 = scmp.lt.s32.totalorder %s3008_s25, %s3008_s25 }
  0x1e   : > { %p2814_p11 = scmp.ne.s32.totalorder %s3008_s25, %s2813_s11  ;;  %p2822_p6 = scmp.lt.s32.totalorder %s2813_s11, %s2813_s11 }
  0x20   : > { %p2816_p8 = pnand %p2814_p11, %p2802_p0  ;;  %p2823_p4 = por %p2822_p6, %p2821_p2 }
  0x22   : > { %p2817_p1 = pneg %p2816_p8 }
  0x24   : > { %p2824_p9 = pnand %p2823_p4, %p2817_p1 }
  0x26   : > { %2827 = shalt.err (!%p2824_p9)
}
  0x27   : > { %s2931_s12 = smov 384   ;;  %s2932_s13 = smov 24  }
  0x28   : > { %2669 = dma.hbm_to_vmem [thread:$0]  (!%p3015_p12), %s3590_s1, 6144, %s3008_s25, [#allocation7], %s2931_s12, %s2931_s12, %s2932_s13  }
  0x29   : > { %p26_p2 = scmp.eq.s32.totalorder %s25_s29, 0  ;;  %p35_p1 = scmp.ne.s32.totalorder %s2924_s17, %s2920_s16 }
  0x2a   : > { %p36_p4 = scmp.eq.s32.totalorder %s2928_s18, 0  ;;  %p2679_p6 = scmp.lt.s32.totalorder %s2928_s18, 2 }
  0x2b   : > { %s3051_s24 = scalar_select %p26_p2, %s2924_s17, %s28_s28  }
  0x2c   : > { %p37_p8 = por %p36_p4, %p35_p1  ;;  %p3601_p9 = scmp.eq.s32.totalorder %s2984_s19, 1 }
  0x2d   : > { %s173_s5 = sand.u32 1, %s2924_s17   ;;  %s2656_s6 = smul.u32 384, %s2928_s18 }
  0x2e   : > { %p3055_p11 = por %p3601_p9, %p35_p1  ;;  %s2655_s7 = smul.u32 24, %s173_s5 }
  0x2f   : > { %p3061_p13 = pnand %p2679_p6, %p37_p8  ;;  %s3068_s28 = scalar_lea.hbm %s3589_s0, %s2656_s6 }
  0x30   : > { %s177_s8 = scalar_lea.vmem [#allocation3], %s2655_s7  ;;  %s174_s10 = scalar_lea.sflag [#allocation4], %s173_s5 }
  0x31   : > { %s185_s9 = sshll.u32 %s177_s8, 4  ;;  %s2828_s11 = scalar_lea.hbm %s3068_s28, 384  ;;  %s3070_s9 = int_to_ptr.vmem [resolvable:$true] %s185_s9 }
  0x32   : > { %p2829_p12 = scmp.ne.s32.totalorder %s3068_s28, %s2828_s11  ;;  %p2830_p0 = pneg %p3061_p13 }
  0x33   : > { %s2833_s14 = scalar_lea.hbm %s3589_s0, 768  ;;  %p2834_p7 = scmp.lt.u32.totalorder %s3068_s28, %s3589_s0 }
  0x34   : > { %p2831_p3 = pnand %p2830_p0, %p2829_p12  ;;  %p2835_p10 = scmp.lt.u32.totalorder %s2833_s14, %s2828_s11 }
  0x35   : > { %p2837_p1 = scmp.lt.u32.totalorder %s2828_s11, %s3068_s28 }
  0x36   : > { %p2832_p5 = pneg %p2831_p3  ;;  %p2836_p2 = por %p2835_p10, %p2834_p7 }
  0x38   : > { %p2838_p4 = por %p2837_p1, %p2836_p2 }
  0x3a   : > { %p2839_p6 = pnand %p2838_p4, %p2832_p5 }
  0x3c   : > { %2842 = shalt.err (!%p2839_p6)
}
  0x3d   : > { %s2843_s5 = scalar_lea.vmem %s3070_s9, 384  ;;  %s2933_s7 = smov [#allocation3]  }
  0x3e   : > { %p2844_p8 = scmp.ne.s32.totalorder %s3070_s9, %s2843_s5  ;;  %s2848_s25 = sshll.u32 %s2933_s7, 4  ;;  %s2849_s25 = int_to_ptr.vmem [resolvable:$false] %s2848_s25 }
  0x3f   : > { %s2850_s29 = scalar_lea.vmem %s2849_s25, 768  ;;  %p2851_p3 = scmp.lt.s32.totalorder %s3070_s9, %s2849_s25 }
  0x40   : > { %p2846_p9 = pnand %p2844_p8, %p2830_p0  ;;  %p2852_p7 = scmp.lt.s32.totalorder %s2850_s29, %s2843_s5 }
  0x42   : > { %p2847_p12 = pneg %p2846_p9  ;;  %p2853_p10 = por %p2852_p7, %p2851_p3 }
  0x44   : > { %p2854_p2 = pnand %p2853_p10, %p2847_p12 }
  0x46   : > { %2857 = shalt.err (!%p2854_p2)
}
  0x47   : > { %2673 = dma.hbm_to_vmem [thread:$0]  (!%p3061_p13), %s3068_s28, 384, %s3070_s9, %s174_s10  }
  0x48   : > { %p3604_p5 = scmp.ne.s32.totalorder %s3599_s23, 0 }
  0x49   : > { %s3100_s8 = sand.u32 (!%p3604_p5), 1, %s2920_s16   ;;  %p3605_p0 = scmp.ne.s32.totalorder (!%p3604_p5), %s3597_s21, 0 }
  0x4a   : > { %194 = sbr.rel (%p3604_p5) target bundleno = 2231 (0x8b7), region = 36  ;;  %s197_s12 = scalar_lea.sflag (!%p3604_p5), [#allocation4], %s3100_s8 }
  0x4b   : > { %s2657_s11 = smul.u32 (!%p3604_p5), 24, %s3100_s8 }
  0x4d   : > { %s3104_s13 = scalar_lea.vmem (!%p3604_p5), [#allocation3], %s2657_s11 }
  0x51   : > { %2903 = dma.done.wait (%p3605_p0), %s197_s12, 384  }
  0x52   : > { %2905 = vsyncadd (%p3605_p0), %s197_s12, 4294966912  ;;  %p3606_p13 = scmp.eq.s32.totalorder %s2984_s19, 0 }
  0x54   : > { %2907 = dma.done.wait (%p3606_p13), [#allocation7], 6144   ;;  %p3607_p1 = pmov %p3606_p13 }
  0x55   : > { %s1762_s23 = sshll.u32 %s3100_s8, 3  ;;  %p3608_p4 = scmp.ne.s32.totalorder %s2984_s19, 0 }
  0x56   : > { %2909 = vsyncadd (%p3607_p1), [#allocation7], 4294961152  ;;  %s3115_s26 = scalar_lea.vmem [#allocation8], %s1762_s23  ;;  %v233_v0 = vld [vmem:[%s3592_s3] sm:$0x1] (!%p3608_p4) }
  0x57   : > { %232 = sbr.rel (%p3608_p4) target bundleno = 94 (0x5e), region = 48  ;;  %234 = vst [vmem:[#allocation2] sm:$0x1] (!%p3608_p4), %v233_v0 }
  0x5e PF: > { %v236_v1 = vld [vmem:[#allocation6 + $0x8] sm:$0xff]  ;;  %v239_v2 = vld [vmem:[#allocation6 + $0x20] sm:$0xff]  ;;  %v238_v5 = vld [vmem:[#allocation6 + $0x18] sm:$0xff]  ;;  %v2934_v8 = vmov 0.0|0.0   ;;  %v2935_v9 = vmov 0.0   ;;  %vm2936_vm0 = vmmov 0  }
  0x5f   : > { %v235_v3 = vld [vmem:[#allocation6] sm:$0xff]  ;;  %v3122_v4 = vpack.c.bf16 %v239_v2, %v236_v1  ;;  %v242_v6 = vld [vmem:[#allocation6 + $0x38] sm:$0xff]  ;;  %v245_v7 = vld [vmem:[#allocation6 + $0x50] sm:$0xff]  ;;  %2239 = vmatprep.subr.bf16.mxu1 %v2934_v8  ;;  %366 = vmatprep.mubr.f32.mxu0 %v2935_v9  ;;  %s1788_s14 = sshll.u32 %s2984_s19, 7  ;;  %s1675_s20 = sshll.u32 %s3115_s26, 4  ;;  %s3546_s20 = int_to_ptr.vmem [resolvable:$true] %s1675_s20 }
  0x60   : > { %v3126_v10 = vpack.c.bf16 %v238_v5, %v235_v3  ;;  %v3128_v11 = vpack.c.bf16 %v245_v7, %v242_v6  ;;  %v241_v12 = vld [vmem:[#allocation6 + $0x30] sm:$0xff]  ;;  %v244_v13 = vld [vmem:[#allocation6 + $0x48] sm:$0xff]  ;;  %1959 = vmatprep.mubr.msk.f32.mxu1 %vm2936_vm0, %v2935_v9  ;;  %v251_v15 = vld [vmem:[#allocation6 + $0x80] sm:$0xff]  ;;  %s3544_s7 = scalar_lea.hbm %s3593_s4, %s1788_s14  ;;  %s1662_s25 = scalar_lea.sflag [#allocation5], %s3100_s8 }
  0x61   : > { %v248_v14 = vld [vmem:[#allocation6 + $0x68] sm:$0xff]  ;;  %2208 = vmatprep.subr.bf16.mxu0 %v3122_v4  ;;  %v3134_v16 = vpack.c.bf16 %v244_v13, %v241_v12  ;;  %v247_v18 = vld [vmem:[#allocation6 + $0x60] sm:$0xff]  ;;  %v250_v19 = vld [vmem:[#allocation6 + $0x78] sm:$0xff]  ;;  %s2858_s29 = scalar_lea.vmem %s3546_s20, 128  ;;  %s2937_s19 = smov [#allocation8]  }
  0x62   : > { %2210 = vmatpush1.bf16.msra.mxu0 %v3126_v10  ;;  %v3137_v17 = vpack.c.bf16 %v251_v15, %v248_v14  ;;  %v254_v20 = vld [vmem:[#allocation6 + $0x98] sm:$0xff]  ;;  %v257_v21 = vld [vmem:[#allocation6 + $0xb0] sm:$0xff]  ;;  %v3140_v22 = vpack.c.bf16 %v250_v19, %v247_v18  ;;  %v256_v25 = vld [vmem:[#allocation6 + $0xa8] sm:$0xff]  ;;  %v287_v19 = vlaneseq  ;;  %p2859_p6 = scmp.ne.s32.totalorder %s3546_s20, %s2858_s29  ;;  %s2862_s11 = sshll.u32 %s2937_s19, 4  ;;  %s2863_s11 = int_to_ptr.vmem [resolvable:$false] %s2862_s11 }
  0x63   : > { %2212 = vmatprep.subr.bf16.mxu0 %v3128_v11  ;;  %v3143_v23 = vpack.c.bf16 %v257_v21, %v254_v20  ;;  %v253_v24 = vld [vmem:[#allocation6 + $0x90] sm:$0xff]  ;;  %v260_v26 = vld [vmem:[#allocation6 + $0xc8] sm:$0xff]  ;;  %v263_v27 = vld [vmem:[#allocation6 + $0xe0] sm:$0xff]  ;;  %s2864_s12 = scalar_lea.vmem %s2863_s11, 256  ;;  %p2865_p12 = scmp.lt.s32.totalorder %s3546_s20, %s2863_s11 }
  0x64   : > { %v237_v28 = vld [vmem:[#allocation6 + $0x10] sm:$0xff]  ;;  %v240_v29 = vld [vmem:[#allocation6 + $0x28] sm:$0xff]  ;;  %v243_v31 = vld [vmem:[#allocation6 + $0x40] sm:$0xff]  ;;  %v3148_v32 = vpack.c.bf16 %v256_v25, %v253_v24  ;;  %v3151_v34 = vpack.c.bf16 %v263_v27, %v260_v26  ;;  %v288_v20 = vshrl.u32 %v287_v19, 7  ;;  %p2860_p8 = pnand %p2859_p6, %p3055_p11  ;;  %p2866_p3 = scmp.lt.s32.totalorder %s2864_s12, %s2858_s29 }
  0x65   : > { %v3145_v30 = vpack.c.bf16 %v240_v29, %v237_v28  ;;  %v246_v33 = vld [vmem:[#allocation6 + $0x58] sm:$0xff]  ;;  %v259_v35 = vld [vmem:[#allocation6 + $0xc0] sm:$0xff]  ;;  %v269_v39 = vld [vmem:[#allocation6 + $0x110] sm:$0xff] }
  0x66   : > { %2214 = vmatpush1.bf16.msra.mxu0 %v3134_v16  ;;  %v262_v36 = vld [vmem:[#allocation6 + $0xd8] sm:$0xff]  ;;  %v3154_v38 = vpack.c.bf16 %v246_v33, %v243_v31  ;;  %v249_v40 = vld [vmem:[#allocation6 + $0x70] sm:$0xff]  ;;  %v252_v41 = vld [vmem:[#allocation6 + $0x88] sm:$0xff]  ;;  %v289_v21 = vsub.s32 0, %v288_v20  ;;  %v293_v25 = vsub.s32 1, %v288_v20  ;;  %p2861_p9 = pneg %p2860_p8  ;;  %p2867_p7 = por %p2866_p3, %p2865_p12 }
  0x67   : > { %2216 = vmatprep.subr.bf16.mxu0 %v3137_v17  ;;  %v266_v37 = vld [vmem:[#allocation6 + $0xf8] sm:$0xff]  ;;  %2241 = vmatpush3.bf16.msra.mxu1 %v3145_v30  ;;  %v3158_v42 = vpack.c.bf16 %v262_v36, %v259_v35  ;;  %v265_v44 = vld [vmem:[#allocation6 + $0xf0] sm:$0xff]  ;;  %v268_v45 = vld [vmem:[#allocation6 + $0x108] sm:$0xff]  ;;  %v3164_v47 = vpack.c.bf16 %v252_v41, %v249_v40 }
  0x68   : > { %2242 = vmatprep.subr.bf16.mxu1 %v2934_v8  ;;  %v3161_v43 = vpack.c.bf16 %v269_v39, %v266_v37  ;;  %v272_v46 = vld [vmem:[#allocation6 + $0x128] sm:$0xff]  ;;  %v275_v48 = vld [vmem:[#allocation6 + $0x140] sm:$0xff]  ;;  %v258_v50 = vld [vmem:[#allocation6 + $0xb8] sm:$0xff]  ;;  %v3168_v51 = vpack.c.bf16 %v268_v45, %v265_v44  ;;  %p2868_p10 = pnand %p2867_p7, %p2861_p9 }
  0x69   : > { %v255_v49 = vld [vmem:[#allocation6 + $0xa0] sm:$0xff]  ;;  %v3171_v52 = vpack.c.bf16 %v275_v48, %v272_v46  ;;  %v274_v54 = vld [vmem:[#allocation6 + $0x138] sm:$0xff]  ;;  %v281_v57 = vld [vmem:[#allocation6 + $0x170] sm:$0xff] }
  0x6a   : > { %2218 = vmatpush1.bf16.msra.mxu0 %v3140_v22  ;;  %v271_v53 = vld [vmem:[#allocation6 + $0x120] sm:$0xff]  ;;  %v278_v55 = vld [vmem:[#allocation6 + $0x158] sm:$0xff]  ;;  %v3174_v56 = vpack.c.bf16 %v258_v50, %v255_v49  ;;  %v261_v58 = vld [vmem:[#allocation6 + $0xd0] sm:$0xff]  ;;  %v297_v49 = vsub.s32 2, %v288_v20 }
  0x6b   : > { %2220 = vmatprep.subr.bf16.mxu0 %v3143_v23  ;;  %2244 = vmatpush3.bf16.msra.mxu1 %v3154_v38  ;;  %v264_v59 = vld [vmem:[#allocation6 + $0xe8] sm:$0xff]  ;;  %v3178_v60 = vpack.c.bf16 %v274_v54, %v271_v53  ;;  %v3181_v61 = vpack.c.bf16 %v281_v57, %v278_v55  ;;  %v277_v62 = vld [vmem:[#allocation6 + $0x150] sm:$0xff]  ;;  %v267_v1 = vld [vmem:[#allocation6 + $0x100] sm:$0xff] }
  0x6c   : > { %2245 = vmatprep.subr.bf16.mxu1 %v2934_v8  ;;  %v280_v63 = vld [vmem:[#allocation6 + $0x168] sm:$0xff]  ;;  %v3184_v0 = vpack.c.bf16 %v264_v59, %v261_v58  ;;  %v270_v2 = vld [vmem:[#allocation6 + $0x118] sm:$0xff]  ;;  %v273_v6 = vld [vmem:[#allocation6 + $0x130] sm:$0xff] }
  0x6d   : > { %v3188_v3 = vpack.c.bf16 %v280_v63, %v277_v62  ;;  %v3192_v5 = vpack.c.bf16 %v270_v2, %v267_v1  ;;  %v276_v7 = vld [vmem:[#allocation6 + $0x148] sm:$0xff]  ;;  %v279_v14 = vld [vmem:[#allocation6 + $0x160] sm:$0xff]  ;;  %v282_v15 = vld [vmem:[#allocation6 + $0x178] sm:$0xff] }
  0x6e   : > { %2222 = vmatpush1.bf16.msra.mxu0 %v3148_v32  ;;  %v3196_v12 = vld [vmem:[#allocation2] sm:$0x1]  ;;  %v3199_v13 = vpack.c.bf16 %v276_v7, %v273_v6  ;;  %v3207_v18 = vpack.c.bf16 %v282_v15, %v279_v14  ;;  %v285_v28 = vld [vmem:[%s3104_s13] ss:$8 sm:$0x7] }
  0x6f   : > { %2224 = vmatprep.subr.bf16.mxu0 %v3151_v34  ;;  %2247 = vmatpush3.bf16.msra.mxu1 %v3164_v47  ;;  %v283_v24 = vld [vmem:[%s3591_s2] sm:$0x7]  ;;  %v451_v36 = vrot.slane %v285_v28, 1  ;;  %v461_v57 = vrot.slane %v285_v28, 2 }
  0x70   : > { %2248 = vmatprep.subr.bf16.mxu1 %v2934_v8  ;;  %v3249_v26 = vrot.slane %v283_v24, %v289_v21  ;;  %v3251_v27 = vrot.slane %v283_v24, %v293_v25  ;;  %v3256_v50 = vrot.slane %v283_v24, %v297_v49 }
  0x72   : > { %2226 = vmatpush1.bf16.msra.mxu0 %v3158_v42 }
  0x73   : > { %2228 = vmatprep.subr.bf16.mxu0 %v3161_v43  ;;  %2250 = vmatpush3.bf16.msra.mxu1 %v3174_v56 }
  0x74   : > { %2251 = vmatprep.subr.bf16.mxu1 %v2934_v8 }
  0x76   : > { %2230 = vmatpush1.bf16.msra.mxu0 %v3168_v51 }
  0x77   : > { %2232 = vmatprep.subr.bf16.mxu0 %v3171_v52  ;;  %2253 = vmatpush3.bf16.msra.mxu1 %v3184_v0 }
  0x78   : > { %2254 = vmatprep.subr.bf16.mxu1 %v2934_v8 }
  0x7a   : > { %2234 = vmatpush1.bf16.msra.mxu0 %v3178_v60 }
  0x7b   : > { %2236 = vmatprep.subr.bf16.mxu0 %v3181_v61  ;;  %2256 = vmatpush3.bf16.msra.mxu1 %v3192_v5 }
  0x7c   : > { %2257 = vmatprep.subr.bf16.mxu1 %v2934_v8 }
  0x7e   : > { %2238 = vmatpush1.bf16.msra.mxu0 %v3188_v3 }
  0x7f   : > { %2264 = vmatprep.subr.bf16.mxu0 %v3122_v4  ;;  %2259 = vmatpush3.bf16.msra.mxu1 %v3199_v13 }
  0x80   : > { %2260 = vmatprep.subr.bf16.mxu1 %v2934_v8 }
  0x81   : > { %367 = vmatmul.mubr.f32.vlgmr.msra.gmra.mrb[0].mxu0 %v3196_v12 }
  0x82   : > { %2266 = vmatpush1.bf16.msra.mxu0 %v3126_v10  ;;  %536 = vmatprep.mubr.f32.mxu0 %v2935_v9 }
  0x83   : > { %2268 = vmatprep.subr.bf16.mxu0 %v3128_v11  ;;  %2262 = vmatpush3.bf16.msra.mxu1 %v3207_v18 }
  0x84   : > { %2295 = vmatprep.subr.bf16.mxu1 %v2934_v8 }
  0x86   : > { %2270 = vmatpush1.bf16.msra.mxu0 %v3134_v16  ;;  %1960 = vmatmul.mubr.f32.vlgmr.msra.gmra.mrb[0].mxu1 %v3196_v12 }
  0x87   : > { %2272 = vmatprep.subr.bf16.mxu0 %v3137_v17  ;;  %2297 = vmatpush3.bf16.msra.mxu1 %v3145_v30 }
  0x88   : > { %2298 = vmatprep.subr.bf16.mxu1 %v2934_v8  ;;  %1994 = vmatprep.mubr.msk.f32.mxu1 %vm2936_vm0, %v2935_v9 }
  0x8a   : > { %2274 = vmatpush1.bf16.msra.mxu0 %v3140_v22 }
  0x8b   : > { %2276 = vmatprep.subr.bf16.mxu0 %v3143_v23  ;;  %2300 = vmatpush3.bf16.msra.mxu1 %v3154_v38 }
  0x8c   : > { %2301 = vmatprep.subr.bf16.mxu1 %v2934_v8 }
  0x8e   : > { %2278 = vmatpush1.bf16.msra.mxu0 %v3148_v32 }
  0x8f   : > { %2280 = vmatprep.subr.bf16.mxu0 %v3151_v34  ;;  %2303 = vmatpush3.bf16.msra.mxu1 %v3164_v47 }
  0x90   : > { %2304 = vmatprep.subr.bf16.mxu1 %v2934_v8 }
  0x92   : > { %2282 = vmatpush1.bf16.msra.mxu0 %v3158_v42 }
  0x93   : > { %2284 = vmatprep.subr.bf16.mxu0 %v3161_v43  ;;  %2306 = vmatpush3.bf16.msra.mxu1 %v3174_v56 }
  0x94   : > { %2307 = vmatprep.subr.bf16.mxu1 %v2934_v8 }
  0x96   : > { %2286 = vmatpush1.bf16.msra.mxu0 %v3168_v51 }
  0x97   : > { %2288 = vmatprep.subr.bf16.mxu0 %v3171_v52  ;;  %2309 = vmatpush3.bf16.msra.mxu1 %v3184_v0 }
  0x98   : > { %2310 = vmatprep.subr.bf16.mxu1 %v2934_v8 }
  0x9a   : > { %2290 = vmatpush1.bf16.msra.mxu0 %v3178_v60 }
  0x9b   : > { %2292 = vmatprep.subr.bf16.mxu0 %v3181_v61  ;;  %2312 = vmatpush3.bf16.msra.mxu1 %v3192_v5 }
  0x9c   : > { %2313 = vmatprep.subr.bf16.mxu1 %v2934_v8 }
  0x9e   : > { %2294 = vmatpush1.bf16.msra.mxu0 %v3188_v3 }
  0x9f   : > { %2320 = vmatprep.subr.bf16.mxu0 %v3122_v4  ;;  %2315 = vmatpush3.bf16.msra.mxu1 %v3199_v13 }
  0xa0   : > { %2316 = vmatprep.subr.bf16.mxu1 %v2934_v8 }
  0xa3   : > { %2318 = vmatpush3.bf16.msra.mxu1 %v3207_v18 }
  0xa4   : > { %2351 = vmatprep.subr.bf16.mxu1 %v2934_v8 }
 0x154   : > { %v368_v29 = vpop.f32.mrb[0].mxu0 }
 0x155   : > { %v369_v31 = vadd.f32 %v368_v29, %v3249_v26  ;;  %v370_v33 = vpop.f32.mrb[1].mxu0 }
 0x156   : > { %v371_v35 = vadd.f32 %v370_v33, %v3251_v27 }
 0x157   : > { %v443_v37 = vadd.f32 %v369_v31, %v285_v28 }
 0x158   : > { %v453_v40 = vadd.f32 %v451_v36, %v371_v35 }
 0x159   : > { %v1764_v39 = vmul.f32 -1.442695, %v443_v37  ;;  %v439_v41 = vpop.f32.mrb[0].mxu1 }
 0x15a   : > { %v1765_v44 = vmul.f32 -1.442695, %v453_v40  ;;  %v1961_v45 = vpop.f32.mrb[1].mxu1  ;;  %v440_v55 = vadd.f32 %v439_v41, %v3256_v50 }
 0x15b   : > { %2720 = vpow2.f32 %v1764_v39 }
 0x15c   : > { %2722 = vpow2.f32 %v1765_v44 }
 0x165   : > { %v2721_v46 = vpop.eup %2720 }
 0x166   : > { %v447_v48 = vadd.f32 1.0, %v2721_v46  ;;  %v2723_v53 = vpop.eup %2722 }
 0x167   : > { %v457_v54 = vadd.f32 1.0, %v2723_v53 }
 0x168   : > { %2724 = vrcp.f32 %v447_v48 }
 0x169   : > { %2726 = vrcp.f32 %v457_v54 }
 0x172   : > { %v2725_v58 = vpop.eup %2724 }
 0x173   : > { %v460_v59 = vmul.f32 %v2725_v58, %v440_v55  ;;  %v2727_v63 = vpop.eup %2726 }
 0x174   : > { %v465_v1 = vsub.f32 1.0, %v2727_v63  ;;  %v467_v7 = vmul.f32 %v2727_v63, %v3196_v12  ;;  %v1766_v12 = vld [vmem:[%s3104_s13 + $0x1] ss:$8 sm:$0x7] }
 0x175   : > { %v463_v62 = vadd.f32 %v461_v57, %v460_v59  ;;  %v621_v28 = vrot.slane %v1766_v12, 1  ;;  %v631_v44 = vrot.slane %v1766_v12, 2  ;;  %v1769_v59 = vld [vmem:[%s3104_s13 + $0x2] ss:$8 sm:$0x7] }
 0x177   : > { %2728 = vtanh.f32 %v463_v62 }
 0x181   : > { %v2729_v2 = vpop.eup %2728 }
 0x182   : > { %v466_v6 = vmul.f32 %v2729_v2, %v465_v1 }
 0x184   : > { %v3260_v14 = vadd.f32 %v467_v7, %v466_v6 }
 0x186   : > { %469 = vst [vmem:[%s3115_s26] sm:$0x1] %v3260_v14  ;;  %537 = vmatmul.mubr.f32.vlgmr.msra.gmra.mrb[2].mxu0 %v3260_v14  ;;  %1995 = vmatmul.mubr.f32.vlgmr.msra.gmra.mrb[2].mxu1 %v3260_v14 }
 0x187   : > { %2322 = vmatpush1.bf16.msra.mxu0 %v3126_v10  ;;  %2353 = vmatpush3.bf16.msra.mxu1 %v3145_v30 }
 0x188   : > { %2324 = vmatprep.subr.bf16.mxu0 %v3128_v11  ;;  %2354 = vmatprep.subr.bf16.mxu1 %v2934_v8 }
 0x189   : > { %706 = vmatprep.mubr.f32.mxu0 %v2935_v9  ;;  %2029 = vmatprep.mubr.msk.f32.mxu1 %vm2936_vm0, %v2935_v9 }
 0x18b   : > { %2326 = vmatpush1.bf16.msra.mxu0 %v3134_v16  ;;  %2356 = vmatpush3.bf16.msra.mxu1 %v3154_v38 }
 0x18c   : > { %2328 = vmatprep.subr.bf16.mxu0 %v3137_v17  ;;  %2357 = vmatprep.subr.bf16.mxu1 %v2934_v8 }
 0x18f   : > { %2330 = vmatpush1.bf16.msra.mxu0 %v3140_v22  ;;  %2359 = vmatpush3.bf16.msra.mxu1 %v3164_v47 }
 0x190   : > { %2332 = vmatprep.subr.bf16.mxu0 %v3143_v23  ;;  %2360 = vmatprep.subr.bf16.mxu1 %v2934_v8 }
 0x193   : > { %2334 = vmatpush1.bf16.msra.mxu0 %v3148_v32  ;;  %2362 = vmatpush3.bf16.msra.mxu1 %v3174_v56 }
 0x194   : > { %2336 = vmatprep.subr.bf16.mxu0 %v3151_v34  ;;  %2363 = vmatprep.subr.bf16.mxu1 %v2934_v8 }
 0x197   : > { %2338 = vmatpush1.bf16.msra.mxu0 %v3158_v42  ;;  %2365 = vmatpush3.bf16.msra.mxu1 %v3184_v0 }
 0x198   : > { %2340 = vmatprep.subr.bf16.mxu0 %v3161_v43  ;;  %2366 = vmatprep.subr.bf16.mxu1 %v2934_v8 }
 0x19b   : > { %2342 = vmatpush1.bf16.msra.mxu0 %v3168_v51  ;;  %2368 = vmatpush3.bf16.msra.mxu1 %v3192_v5 }
 0x19c   : > { %2344 = vmatprep.subr.bf16.mxu0 %v3171_v52  ;;  %2369 = vmatprep.subr.bf16.mxu1 %v2934_v8 }
 0x19f   : > { %2346 = vmatpush1.bf16.msra.mxu0 %v3178_v60  ;;  %2371 = vmatpush3.bf16.msra.mxu1 %v3199_v13 }
 0x1a0   : > { %2348 = vmatprep.subr.bf16.mxu0 %v3181_v61  ;;  %2372 = vmatprep.subr.bf16.mxu1 %v2934_v8 }
 0x1a3   : > { %2350 = vmatpush1.bf16.msra.mxu0 %v3188_v3  ;;  %2374 = vmatpush3.bf16.msra.mxu1 %v3207_v18 }
 0x1a4   : > { %2376 = vmatprep.subr.bf16.mxu0 %v3122_v4  ;;  %2407 = vmatprep.subr.bf16.mxu1 %v2934_v8 }
 0x259   : > { %v538_v15 = vpop.f32.mrb[2].mxu0  ;;  %v609_v19 = vpop.f32.mrb[2].mxu1 }
 0x25a   : > { %v539_v20 = vadd.f32 %v538_v15, %v3249_v26  ;;  %v540_v21 = vpop.f32.mrb[3].mxu0  ;;  %v1996_v24 = vpop.f32.mrb[3].mxu1  ;;  %v610_v41 = vadd.f32 %v609_v19, %v3256_v50 }
 0x25b   : > { %v541_v25 = vadd.f32 %v540_v21, %v3251_v27 }
 0x25c   : > { %v613_v29 = vadd.f32 %v1766_v12, %v539_v20 }
 0x25d   : > { %v623_v33 = vadd.f32 %v621_v28, %v541_v25 }
 0x25e   : > { %v1767_v31 = vmul.f32 -1.442695, %v613_v29 }
 0x25f   : > { %v1768_v35 = vmul.f32 -1.442695, %v623_v33 }
 0x260   : > { %2730 = vpow2.f32 %v1767_v31  ;;  %v801_v31 = vrot.slane %v1769_v59, 2 }
 0x261   : > { %2732 = vpow2.f32 %v1768_v35 }
 0x26a   : > { %v2731_v36 = vpop.eup %2730 }
 0x26b   : > { %v617_v37 = vadd.f32 1.0, %v2731_v36  ;;  %v2733_v39 = vpop.eup %2732 }
 0x26c   : > { %v627_v40 = vadd.f32 1.0, %v2733_v39 }
 0x26d   : > { %2734 = vrcp.f32 %v617_v37 }
 0x26e   : > { %2736 = vrcp.f32 %v627_v40 }
 0x277   : > { %v2735_v45 = vpop.eup %2734 }
 0x278   : > { %v630_v46 = vmul.f32 %v2735_v45, %v610_v41  ;;  %v2737_v49 = vpop.eup %2736 }
 0x279   : > { %v635_v53 = vsub.f32 1.0, %v2737_v49  ;;  %v637_v57 = vmul.f32 %v2737_v49, %v3260_v14  ;;  %v791_v14 = vrot.slane %v1769_v59, 1 }
 0x27a   : > { %v633_v48 = vadd.f32 %v631_v44, %v630_v46  ;;  %v1772_v46 = vld [vmem:[%s3104_s13 + $0x3] ss:$8 sm:$0x7] }
 0x27c   : > { %2738 = vtanh.f32 %v633_v48 }
 0x286   : > { %v2739_v54 = vpop.eup %2738 }
 0x287   : > { %v636_v55 = vmul.f32 %v2739_v54, %v635_v53 }
 0x289   : > { %v3306_v58 = vadd.f32 %v637_v57, %v636_v55 }
 0x28b   : > { %639 = vst [vmem:[%s3115_s26 + $0x1] sm:$0x1] %v3306_v58  ;;  %707 = vmatmul.mubr.f32.vlgmr.msra.gmra.mrb[4].mxu0 %v3306_v58  ;;  %2030 = vmatmul.mubr.f32.vlgmr.msra.gmra.mrb[4].mxu1 %v3306_v58 }
 0x28c   : > { %2378 = vmatpush1.bf16.msra.mxu0 %v3126_v10  ;;  %2409 = vmatpush3.bf16.msra.mxu1 %v3145_v30 }
 0x28d   : > { %2380 = vmatprep.subr.bf16.mxu0 %v3128_v11  ;;  %2410 = vmatprep.subr.bf16.mxu1 %v2934_v8 }
 0x28e   : > { %876 = vmatprep.mubr.f32.mxu0 %v2935_v9  ;;  %2064 = vmatprep.mubr.msk.f32.mxu1 %vm2936_vm0, %v2935_v9 }
 0x290   : > { %2382 = vmatpush1.bf16.msra.mxu0 %v3134_v16  ;;  %2412 = vmatpush3.bf16.msra.mxu1 %v3154_v38 }
 0x291   : > { %2384 = vmatprep.subr.bf16.mxu0 %v3137_v17  ;;  %2413 = vmatprep.subr.bf16.mxu1 %v2934_v8 }
 0x294   : > { %2386 = vmatpush1.bf16.msra.mxu0 %v3140_v22  ;;  %2415 = vmatpush3.bf16.msra.mxu1 %v3164_v47 }
 0x295   : > { %2388 = vmatprep.subr.bf16.mxu0 %v3143_v23  ;;  %2416 = vmatprep.subr.bf16.mxu1 %v2934_v8 }
 0x298   : > { %2390 = vmatpush1.bf16.msra.mxu0 %v3148_v32  ;;  %2418 = vmatpush3.bf16.msra.mxu1 %v3174_v56 }
 0x299   : > { %2392 = vmatprep.subr.bf16.mxu0 %v3151_v34  ;;  %2419 = vmatprep.subr.bf16.mxu1 %v2934_v8 }
 0x29c   : > { %2394 = vmatpush1.bf16.msra.mxu0 %v3158_v42  ;;  %2421 = vmatpush3.bf16.msra.mxu1 %v3184_v0 }
 0x29d   : > { %2396 = vmatprep.subr.bf16.mxu0 %v3161_v43  ;;  %2422 = vmatprep.subr.bf16.mxu1 %v2934_v8 }
 0x2a0   : > { %2398 = vmatpush1.bf16.msra.mxu0 %v3168_v51  ;;  %2424 = vmatpush3.bf16.msra.mxu1 %v3192_v5 }
 0x2a1   : > { %2400 = vmatprep.subr.bf16.mxu0 %v3171_v52  ;;  %2425 = vmatprep.subr.bf16.mxu1 %v2934_v8 }
 0x2a4   : > { %2402 = vmatpush1.bf16.msra.mxu0 %v3178_v60  ;;  %2427 = vmatpush3.bf16.msra.mxu1 %v3199_v13 }
 0x2a5   : > { %2404 = vmatprep.subr.bf16.mxu0 %v3181_v61  ;;  %2428 = vmatprep.subr.bf16.mxu1 %v2934_v8 }
 0x2a8   : > { %2406 = vmatpush1.bf16.msra.mxu0 %v3188_v3  ;;  %2430 = vmatpush3.bf16.msra.mxu1 %v3207_v18 }
 0x2a9   : > { %2432 = vmatprep.subr.bf16.mxu0 %v3122_v4  ;;  %2463 = vmatprep.subr.bf16.mxu1 %v2934_v8 }
 0x35e   : > { %v708_v62 = vpop.f32.mrb[4].mxu0  ;;  %v779_v63 = vpop.f32.mrb[4].mxu1 }
 0x35f   : > { %v709_v1 = vadd.f32 %v708_v62, %v3249_v26  ;;  %v710_v2 = vpop.f32.mrb[5].mxu0  ;;  %v2031_v6 = vpop.f32.mrb[5].mxu1  ;;  %v780_v29 = vadd.f32 %v779_v63, %v3256_v50 }
 0x360   : > { %v711_v7 = vadd.f32 %v710_v2, %v3251_v27 }
 0x361   : > { %v783_v12 = vadd.f32 %v1769_v59, %v709_v1 }
 0x362   : > { %v793_v19 = vadd.f32 %v791_v14, %v711_v7 }
 0x363   : > { %v1770_v15 = vmul.f32 -1.442695, %v783_v12 }
 0x364   : > { %v1771_v20 = vmul.f32 -1.442695, %v793_v19 }
 0x365   : > { %2740 = vpow2.f32 %v1770_v15  ;;  %v971_v15 = vrot.slane %v1772_v46, 2 }
 0x366   : > { %2742 = vpow2.f32 %v1771_v20 }
 0x36f   : > { %v2741_v21 = vpop.eup %2740 }
 0x370   : > { %v787_v24 = vadd.f32 1.0, %v2741_v21  ;;  %v2743_v25 = vpop.eup %2742 }
 0x371   : > { %v797_v28 = vadd.f32 1.0, %v2743_v25 }
 0x372   : > { %2744 = vrcp.f32 %v787_v24 }
 0x373   : > { %2746 = vrcp.f32 %v797_v28 }
 0x37c   : > { %v2745_v33 = vpop.eup %2744 }
 0x37d   : > { %v800_v35 = vmul.f32 %v2745_v33, %v780_v29  ;;  %v2747_v37 = vpop.eup %2746 }
 0x37e   : > { %v805_v39 = vsub.f32 1.0, %v2747_v37  ;;  %v807_v44 = vmul.f32 %v2747_v37, %v3306_v58  ;;  %v961_v58 = vrot.slane %v1772_v46, 1 }
 0x37f   : > { %v803_v36 = vadd.f32 %v801_v31, %v800_v35  ;;  %v1775_v35 = vld [vmem:[%s3104_s13 + $0x4] ss:$8 sm:$0x7] }
 0x381   : > { %2748 = vtanh.f32 %v803_v36 }
 0x38b   : > { %v2749_v40 = vpop.eup %2748 }
 0x38c   : > { %v806_v41 = vmul.f32 %v2749_v40, %v805_v39 }
 0x38e   : > { %v3352_v45 = vadd.f32 %v807_v44, %v806_v41 }
 0x390   : > { %809 = vst [vmem:[%s3115_s26 + $0x2] sm:$0x1] %v3352_v45  ;;  %877 = vmatmul.mubr.f32.vlgmr.msra.gmra.mrb[6].mxu0 %v3352_v45  ;;  %2065 = vmatmul.mubr.f32.vlgmr.msra.gmra.mrb[6].mxu1 %v3352_v45 }
 0x391   : > { %2434 = vmatpush1.bf16.msra.mxu0 %v3126_v10  ;;  %2465 = vmatpush3.bf16.msra.mxu1 %v3145_v30 }
 0x392   : > { %2436 = vmatprep.subr.bf16.mxu0 %v3128_v11  ;;  %2466 = vmatprep.subr.bf16.mxu1 %v2934_v8 }
 0x393   : > { %1046 = vmatprep.mubr.f32.mxu0 %v2935_v9  ;;  %2099 = vmatprep.mubr.msk.f32.mxu1 %vm2936_vm0, %v2935_v9 }
 0x395   : > { %2438 = vmatpush1.bf16.msra.mxu0 %v3134_v16  ;;  %2468 = vmatpush3.bf16.msra.mxu1 %v3154_v38 }
 0x396   : > { %2440 = vmatprep.subr.bf16.mxu0 %v3137_v17  ;;  %2469 = vmatprep.subr.bf16.mxu1 %v2934_v8 }
 0x399   : > { %2442 = vmatpush1.bf16.msra.mxu0 %v3140_v22  ;;  %2471 = vmatpush3.bf16.msra.mxu1 %v3164_v47 }
 0x39a   : > { %2444 = vmatprep.subr.bf16.mxu0 %v3143_v23  ;;  %2472 = vmatprep.subr.bf16.mxu1 %v2934_v8 }
 0x39d   : > { %2446 = vmatpush1.bf16.msra.mxu0 %v3148_v32  ;;  %2474 = vmatpush3.bf16.msra.mxu1 %v3174_v56 }
 0x39e   : > { %2448 = vmatprep.subr.bf16.mxu0 %v3151_v34  ;;  %2475 = vmatprep.subr.bf16.mxu1 %v2934_v8 }
 0x3a1   : > { %2450 = vmatpush1.bf16.msra.mxu0 %v3158_v42  ;;  %2477 = vmatpush3.bf16.msra.mxu1 %v3184_v0 }
 0x3a2   : > { %2452 = vmatprep.subr.bf16.mxu0 %v3161_v43  ;;  %2478 = vmatprep.subr.bf16.mxu1 %v2934_v8 }
 0x3a5   : > { %2454 = vmatpush1.bf16.msra.mxu0 %v3168_v51  ;;  %2480 = vmatpush3.bf16.msra.mxu1 %v3192_v5 }
 0x3a6   : > { %2456 = vmatprep.subr.bf16.mxu0 %v3171_v52  ;;  %2481 = vmatprep.subr.bf16.mxu1 %v2934_v8 }
 0x3a9   : > { %2458 = vmatpush1.bf16.msra.mxu0 %v3178_v60  ;;  %2483 = vmatpush3.bf16.msra.mxu1 %v3199_v13 }
 0x3aa   : > { %2460 = vmatprep.subr.bf16.mxu0 %v3181_v61  ;;  %2484 = vmatprep.subr.bf16.mxu1 %v2934_v8 }
 0x3ad   : > { %2462 = vmatpush1.bf16.msra.mxu0 %v3188_v3  ;;  %2486 = vmatpush3.bf16.msra.mxu1 %v3207_v18 }
 0x3ae   : > { %2488 = vmatprep.subr.bf16.mxu0 %v3122_v4  ;;  %2519 = vmatprep.subr.bf16.mxu1 %v2934_v8 }
 0x463   : > { %v878_v48 = vpop.f32.mrb[6].mxu0  ;;  %v949_v49 = vpop.f32.mrb[6].mxu1 }
 0x464   : > { %v879_v53 = vadd.f32 %v878_v48, %v3249_v26  ;;  %v880_v54 = vpop.f32.mrb[7].mxu0  ;;  %v2066_v55 = vpop.f32.mrb[7].mxu1  ;;  %v950_v12 = vadd.f32 %v949_v49, %v3256_v50 }
 0x465   : > { %v881_v57 = vadd.f32 %v880_v54, %v3251_v27 }
 0x466   : > { %v953_v59 = vadd.f32 %v1772_v46, %v879_v53 }
 0x467   : > { %v963_v63 = vadd.f32 %v961_v58, %v881_v57 }
 0x468   : > { %v1773_v62 = vmul.f32 -1.442695, %v953_v59 }
 0x469   : > { %v1774_v1 = vmul.f32 -1.442695, %v963_v63 }
 0x46a   : > { %2750 = vpow2.f32 %v1773_v62  ;;  %v1141_v62 = vrot.slane %v1775_v35, 2 }
 0x46b   : > { %2752 = vpow2.f32 %v1774_v1 }
 0x474   : > { %v2751_v2 = vpop.eup %2750 }
 0x475   : > { %v957_v6 = vadd.f32 1.0, %v2751_v2  ;;  %v2753_v7 = vpop.eup %2752 }
 0x476   : > { %v967_v14 = vadd.f32 1.0, %v2753_v7 }
 0x477   : > { %2754 = vrcp.f32 %v957_v6 }
 0x478   : > { %2756 = vrcp.f32 %v967_v14 }
 0x481   : > { %v2755_v19 = vpop.eup %2754 }
 0x482   : > { %v970_v20 = vmul.f32 %v2755_v19, %v950_v12  ;;  %v2757_v24 = vpop.eup %2756 }
 0x483   : > { %v975_v25 = vsub.f32 1.0, %v2757_v24  ;;  %v977_v31 = vmul.f32 %v2757_v24, %v3352_v45  ;;  %v1131_v45 = vrot.slane %v1775_v35, 1 }
 0x484   : > { %v973_v21 = vadd.f32 %v971_v15, %v970_v20  ;;  %v1778_v20 = vld [vmem:[%s3104_s13 + $0x5] ss:$8 sm:$0x7] }
 0x486   : > { %2758 = vtanh.f32 %v973_v21 }
 0x490   : > { %v2759_v28 = vpop.eup %2758 }
 0x491   : > { %v976_v29 = vmul.f32 %v2759_v28, %v975_v25 }
 0x493   : > { %v3398_v33 = vadd.f32 %v977_v31, %v976_v29 }
 0x495   : > { %979 = vst [vmem:[%s3115_s26 + $0x3] sm:$0x1] %v3398_v33  ;;  %1047 = vmatmul.mubr.f32.vlgmr.msra.gmra.mrb[8].mxu0 %v3398_v33  ;;  %2100 = vmatmul.mubr.f32.vlgmr.msra.gmra.mrb[8].mxu1 %v3398_v33 }
 0x496   : > { %2490 = vmatpush1.bf16.msra.mxu0 %v3126_v10  ;;  %2521 = vmatpush3.bf16.msra.mxu1 %v3145_v30 }
 0x497   : > { %2492 = vmatprep.subr.bf16.mxu0 %v3128_v11  ;;  %2522 = vmatprep.subr.bf16.mxu1 %v2934_v8 }
 0x498   : > { %1216 = vmatprep.mubr.f32.mxu0 %v2935_v9  ;;  %2134 = vmatprep.mubr.msk.f32.mxu1 %vm2936_vm0, %v2935_v9 }
 0x49a   : > { %2494 = vmatpush1.bf16.msra.mxu0 %v3134_v16  ;;  %2524 = vmatpush3.bf16.msra.mxu1 %v3154_v38 }
 0x49b   : > { %2496 = vmatprep.subr.bf16.mxu0 %v3137_v17  ;;  %2525 = vmatprep.subr.bf16.mxu1 %v2934_v8 }
 0x49e   : > { %2498 = vmatpush1.bf16.msra.mxu0 %v3140_v22  ;;  %2527 = vmatpush3.bf16.msra.mxu1 %v3164_v47 }
 0x49f   : > { %2500 = vmatprep.subr.bf16.mxu0 %v3143_v23  ;;  %2528 = vmatprep.subr.bf16.mxu1 %v2934_v8 }
 0x4a2   : > { %2502 = vmatpush1.bf16.msra.mxu0 %v3148_v32  ;;  %2530 = vmatpush3.bf16.msra.mxu1 %v3174_v56 }
 0x4a3   : > { %2504 = vmatprep.subr.bf16.mxu0 %v3151_v34  ;;  %2531 = vmatprep.subr.bf16.mxu1 %v2934_v8 }
 0x4a6   : > { %2506 = vmatpush1.bf16.msra.mxu0 %v3158_v42  ;;  %2533 = vmatpush3.bf16.msra.mxu1 %v3184_v0 }
 0x4a7   : > { %2508 = vmatprep.subr.bf16.mxu0 %v3161_v43  ;;  %2534 = vmatprep.subr.bf16.mxu1 %v2934_v8 }
 0x4aa   : > { %2510 = vmatpush1.bf16.msra.mxu0 %v3168_v51  ;;  %2536 = vmatpush3.bf16.msra.mxu1 %v3192_v5 }
 0x4ab   : > { %2512 = vmatprep.subr.bf16.mxu0 %v3171_v52  ;;  %2537 = vmatprep.subr.bf16.mxu1 %v2934_v8 }
 0x4ae   : > { %2514 = vmatpush1.bf16.msra.mxu0 %v3178_v60  ;;  %2539 = vmatpush3.bf16.msra.mxu1 %v3199_v13 }
 0x4af   : > { %2516 = vmatprep.subr.bf16.mxu0 %v3181_v61  ;;  %2540 = vmatprep.subr.bf16.mxu1 %v2934_v8 }
 0x4b2   : > { %2518 = vmatpush1.bf16.msra.mxu0 %v3188_v3  ;;  %2542 = vmatpush3.bf16.msra.mxu1 %v3207_v18 }
 0x4b3   : > { %2544 = vmatprep.subr.bf16.mxu0 %v3122_v4  ;;  %2575 = vmatprep.subr.bf16.mxu1 %v2934_v8 }
 0x568   : > { %v1048_v36 = vpop.f32.mrb[8].mxu0  ;;  %v1119_v37 = vpop.f32.mrb[8].mxu1 }
 0x569   : > { %v1049_v39 = vadd.f32 %v1048_v36, %v3249_v26  ;;  %v1050_v40 = vpop.f32.mrb[9].mxu0  ;;  %v2101_v41 = vpop.f32.mrb[9].mxu1  ;;  %v1120_v59 = vadd.f32 %v1119_v37, %v3256_v50 }
 0x56a   : > { %v1051_v44 = vadd.f32 %v1050_v40, %v3251_v27 }
 0x56b   : > { %v1123_v46 = vadd.f32 %v1775_v35, %v1049_v39 }
 0x56c   : > { %v1133_v49 = vadd.f32 %v1131_v45, %v1051_v44 }
 0x56d   : > { %v1776_v48 = vmul.f32 -1.442695, %v1123_v46  ;;  %v1311_v46 = vrot.slane %v1778_v20, 2 }
 0x56e   : > { %v1777_v53 = vmul.f32 -1.442695, %v1133_v49 }
 0x56f   : > { %2760 = vpow2.f32 %v1776_v48 }
 0x570   : > { %2762 = vpow2.f32 %v1777_v53 }
 0x579   : > { %v2761_v54 = vpop.eup %2760 }
 0x57a   : > { %v1127_v55 = vadd.f32 1.0, %v2761_v54  ;;  %v2763_v57 = vpop.eup %2762 }
 0x57b   : > { %v1137_v58 = vadd.f32 1.0, %v2763_v57 }
 0x57c   : > { %2764 = vrcp.f32 %v1127_v55 }
 0x57d   : > { %2766 = vrcp.f32 %v1137_v58 }
 0x586   : > { %v2765_v63 = vpop.eup %2764 }
 0x587   : > { %v1140_v1 = vmul.f32 %v2765_v63, %v1120_v59  ;;  %v2767_v6 = vpop.eup %2766 }
 0x588   : > { %v1145_v7 = vsub.f32 1.0, %v2767_v6  ;;  %v1147_v15 = vmul.f32 %v2767_v6, %v3398_v33  ;;  %v1301_v33 = vrot.slane %v1778_v20, 1 }
 0x589   : > { %v1143_v2 = vadd.f32 %v1141_v62, %v1140_v1 }
 0x58b   : > { %2768 = vtanh.f32 %v1143_v2  ;;  %v1784_v2 = vld [vmem:[%s3104_s13 + $0x7] ss:$8 sm:$0x7] }
 0x595   : > { %v2769_v14 = vpop.eup %2768 }
 0x596   : > { %v1146_v12 = vmul.f32 %v2769_v14, %v1145_v7 }
 0x598   : > { %v3444_v19 = vadd.f32 %v1147_v15, %v1146_v12 }
 0x59a   : > { %1149 = vst [vmem:[%s3115_s26 + $0x4] sm:$0x1] %v3444_v19  ;;  %1217 = vmatmul.mubr.f32.vlgmr.msra.gmra.mrb[10].mxu0 %v3444_v19  ;;  %2135 = vmatmul.mubr.f32.vlgmr.msra.gmra.mrb[10].mxu1 %v3444_v19 }
 0x59b   : > { %2546 = vmatpush1.bf16.msra.mxu0 %v3126_v10  ;;  %2577 = vmatpush3.bf16.msra.mxu1 %v3145_v30 }
 0x59c   : > { %2548 = vmatprep.subr.bf16.mxu0 %v3128_v11  ;;  %2578 = vmatprep.subr.bf16.mxu1 %v2934_v8 }
 0x59d   : > { %1386 = vmatprep.mubr.f32.mxu0 %v2935_v9  ;;  %2169 = vmatprep.mubr.msk.f32.mxu1 %vm2936_vm0, %v2935_v9 }
 0x59f   : > { %2550 = vmatpush1.bf16.msra.mxu0 %v3134_v16  ;;  %2580 = vmatpush3.bf16.msra.mxu1 %v3154_v38 }
 0x5a0   : > { %2552 = vmatprep.subr.bf16.mxu0 %v3137_v17  ;;  %2581 = vmatprep.subr.bf16.mxu1 %v2934_v8 }
 0x5a3   : > { %2554 = vmatpush1.bf16.msra.mxu0 %v3140_v22  ;;  %2583 = vmatpush3.bf16.msra.mxu1 %v3164_v47 }
 0x5a4   : > { %2556 = vmatprep.subr.bf16.mxu0 %v3143_v23  ;;  %2584 = vmatprep.subr.bf16.mxu1 %v2934_v8 }
 0x5a7   : > { %2558 = vmatpush1.bf16.msra.mxu0 %v3148_v32  ;;  %2586 = vmatpush3.bf16.msra.mxu1 %v3174_v56 }
 0x5a8   : > { %2560 = vmatprep.subr.bf16.mxu0 %v3151_v34  ;;  %2587 = vmatprep.subr.bf16.mxu1 %v2934_v8 }
 0x5ab   : > { %2562 = vmatpush1.bf16.msra.mxu0 %v3158_v42  ;;  %2589 = vmatpush3.bf16.msra.mxu1 %v3184_v0 }
 0x5ac   : > { %2564 = vmatprep.subr.bf16.mxu0 %v3161_v43  ;;  %2590 = vmatprep.subr.bf16.mxu1 %v2934_v8 }
 0x5af   : > { %2566 = vmatpush1.bf16.msra.mxu0 %v3168_v51  ;;  %2592 = vmatpush3.bf16.msra.mxu1 %v3192_v5 }
 0x5b0   : > { %2568 = vmatprep.subr.bf16.mxu0 %v3171_v52  ;;  %2593 = vmatprep.subr.bf16.mxu1 %v2934_v8 }
 0x5b3   : > { %2570 = vmatpush1.bf16.msra.mxu0 %v3178_v60  ;;  %2595 = vmatpush3.bf16.msra.mxu1 %v3199_v13 }
 0x5b4   : > { %2572 = vmatprep.subr.bf16.mxu0 %v3181_v61  ;;  %2596 = vmatprep.subr.bf16.mxu1 %v2934_v8 }
 0x5b7   : > { %2574 = vmatpush1.bf16.msra.mxu0 %v3188_v3  ;;  %2598 = vmatpush3.bf16.msra.mxu1 %v3207_v18 }
 0x5b8   : > { %2600 = vmatprep.subr.bf16.mxu0 %v3122_v4  ;;  %2631 = vmatprep.subr.bf16.mxu1 %v2934_v8 }
 0x66d   : > { %v1218_v21 = vpop.f32.mrb[10].mxu0  ;;  %v1289_v24 = vpop.f32.mrb[10].mxu1 }
 0x66e   : > { %v1219_v25 = vadd.f32 %v1218_v21, %v3249_v26  ;;  %v1220_v28 = vpop.f32.mrb[11].mxu0  ;;  %v2136_v29 = vpop.f32.mrb[11].mxu1  ;;  %v1290_v45 = vadd.f32 %v1289_v24, %v3256_v50 }
 0x66f   : > { %v1221_v31 = vadd.f32 %v1220_v28, %v3251_v27 }
 0x670   : > { %v1293_v35 = vadd.f32 %v1778_v20, %v1219_v25  ;;  %v1641_v20 = vrot.slane %v1784_v2, 1 }
 0x671   : > { %v1303_v37 = vadd.f32 %v1301_v33, %v1221_v31 }
 0x672   : > { %v1779_v36 = vmul.f32 -1.442695, %v1293_v35 }
 0x673   : > { %v1780_v39 = vmul.f32 -1.442695, %v1303_v37 }
 0x674   : > { %2770 = vpow2.f32 %v1779_v36  ;;  %v1651_v36 = vrot.slane %v1784_v2, 2 }
 0x675   : > { %2772 = vpow2.f32 %v1780_v39 }
 0x67e   : > { %v2771_v40 = vpop.eup %2770 }
 0x67f   : > { %v1297_v4 = vadd.f32 1.0, %v2771_v40  ;;  %v2773_v41 = vpop.eup %2772 }
 0x680   : > { %v1307_v44 = vadd.f32 1.0, %v2773_v41 }
 0x681   : > { %2774 = vrcp.f32 %v1297_v4 }
 0x682   : > { %2776 = vrcp.f32 %v1307_v44 }
 0x68b   : > { %v2775_v48 = vpop.eup %2774 }
 0x68c   : > { %v1310_v49 = vmul.f32 %v2775_v48, %v1290_v45  ;;  %v2777_v54 = vpop.eup %2776 }
 0x68d   : > { %v1315_v55 = vsub.f32 1.0, %v2777_v54  ;;  %v1317_v59 = vmul.f32 %v2777_v54, %v3444_v19 }
 0x68e   : > { %v1313_v53 = vadd.f32 %v1311_v46, %v1310_v49 }
 0x690   : > { %2778 = vtanh.f32 %v1313_v53 }
 0x69a   : > { %v2779_v57 = vpop.eup %2778 }
 0x69b   : > { %v1316_v58 = vmul.f32 %v2779_v57, %v1315_v55 }
 0x69d   : > { %v3490_v62 = vadd.f32 %v1317_v59, %v1316_v58 }
 0x69f   : > { %1319 = vst [vmem:[%s3115_s26 + $0x5] sm:$0x1] %v3490_v62  ;;  %1387 = vmatmul.mubr.f32.vlgmr.msra.gmra.mrb[12].mxu0 %v3490_v62  ;;  %2170 = vmatmul.mubr.f32.vlgmr.msra.gmra.mrb[12].mxu1 %v3490_v62 }
 0x6a0   : > { %2602 = vmatpush1.bf16.msra.mxu0 %v3126_v10  ;;  %2633 = vmatpush3.bf16.msra.mxu1 %v3145_v30 }
 0x6a1   : > { %2604 = vmatprep.subr.bf16.mxu0 %v3128_v11  ;;  %2634 = vmatprep.subr.bf16.mxu1 %v2934_v8 }
 0x6a2   : > { %1556 = vmatprep.mubr.f32.mxu0 %v2935_v9  ;;  %2204 = vmatprep.mubr.msk.f32.mxu1 %vm2936_vm0, %v2935_v9  ;;  %v1781_v9 = vld [vmem:[%s3104_s13 + $0x6] ss:$8 sm:$0x7] }
 0x6a3   : > { %v1471_v30 = vrot.slane %v1781_v9, 1 }
 0x6a4   : > { %2606 = vmatpush1.bf16.msra.mxu0 %v3134_v16  ;;  %2636 = vmatpush3.bf16.msra.mxu1 %v3154_v38 }
 0x6a5   : > { %2608 = vmatprep.subr.bf16.mxu0 %v3137_v17  ;;  %2637 = vmatprep.subr.bf16.mxu1 %v2934_v8 }
 0x6a8   : > { %2610 = vmatpush1.bf16.msra.mxu0 %v3140_v22  ;;  %2639 = vmatpush3.bf16.msra.mxu1 %v3164_v47 }
 0x6a9   : > { %2612 = vmatprep.subr.bf16.mxu0 %v3143_v23  ;;  %2640 = vmatprep.subr.bf16.mxu1 %v2934_v8 }
 0x6ac   : > { %2614 = vmatpush1.bf16.msra.mxu0 %v3148_v32  ;;  %2642 = vmatpush3.bf16.msra.mxu1 %v3174_v56  ;;  %v1481_v56 = vrot.slane %v1781_v9, 2 }
 0x6ad   : > { %2616 = vmatprep.subr.bf16.mxu0 %v3151_v34  ;;  %2643 = vmatprep.subr.bf16.mxu1 %v2934_v8 }
 0x6b0   : > { %2618 = vmatpush1.bf16.msra.mxu0 %v3158_v42  ;;  %2645 = vmatpush3.bf16.msra.mxu1 %v3184_v0 }
 0x6b1   : > { %2620 = vmatprep.subr.bf16.mxu0 %v3161_v43  ;;  %2646 = vmatprep.subr.bf16.mxu1 %v2934_v8 }
 0x6b4   : > { %2622 = vmatpush1.bf16.msra.mxu0 %v3168_v51  ;;  %2648 = vmatpush3.bf16.msra.mxu1 %v3192_v5 }
 0x6b5   : > { %2624 = vmatprep.subr.bf16.mxu0 %v3171_v52  ;;  %2649 = vmatprep.subr.bf16.mxu1 %v2934_v8 }
 0x6b8   : > { %2626 = vmatpush1.bf16.msra.mxu0 %v3178_v60  ;;  %2651 = vmatpush3.bf16.msra.mxu1 %v3199_v13 }
 0x6b9   : > { %2628 = vmatprep.subr.bf16.mxu0 %v3181_v61  ;;  %2652 = vmatprep.subr.bf16.mxu1 %v2934_v8 }
 0x6bc   : > { %2630 = vmatpush1.bf16.msra.mxu0 %v3188_v3  ;;  %2654 = vmatpush3.bf16.msra.mxu1 %v3207_v18 }
 0x772   : > { %v1388_v10 = vpop.f32.mrb[12].mxu0  ;;  %v1459_v11 = vpop.f32.mrb[12].mxu1 }
 0x773   : > { %v1389_v16 = vadd.f32 %v1388_v10, %v3249_v26  ;;  %v1390_v17 = vpop.f32.mrb[13].mxu0  ;;  %v2171_v22 = vpop.f32.mrb[13].mxu1  ;;  %v1460_v52 = vadd.f32 %v1459_v11, %v3256_v50 }
 0x774   : > { %v1391_v23 = vadd.f32 %v1390_v17, %v3251_v27 }
 0x775   : > { %v1463_v32 = vadd.f32 %v1781_v9, %v1389_v16 }
 0x776   : > { %v1473_v38 = vadd.f32 %v1471_v30, %v1391_v23 }
 0x777   : > { %v1782_v34 = vmul.f32 -1.442695, %v1463_v32 }
 0x778   : > { %v1783_v42 = vmul.f32 -1.442695, %v1473_v38 }
 0x779   : > { %2780 = vpow2.f32 %v1782_v34 }
 0x77a   : > { %2782 = vpow2.f32 %v1783_v42 }
 0x783   : > { %v2781_v8 = vpop.eup %2780 }
 0x784   : > { %v1467_v43 = vadd.f32 1.0, %v2781_v8  ;;  %v2783_v47 = vpop.eup %2782 }
 0x785   : > { %v1477_v51 = vadd.f32 1.0, %v2783_v47 }
 0x786   : > { %2784 = vrcp.f32 %v1467_v43 }
 0x787   : > { %2786 = vrcp.f32 %v1477_v51 }
 0x790   : > { %v2785_v60 = vpop.eup %2784 }
 0x791   : > { %v1480_v61 = vmul.f32 %v2785_v60, %v1460_v52  ;;  %v2787_v3 = vpop.eup %2786 }
 0x792   : > { %v1485_v5 = vsub.f32 1.0, %v2787_v3  ;;  %v1487_v63 = vmul.f32 %v2787_v3, %v3490_v62 }
 0x793   : > { %v1483_v0 = vadd.f32 %v1481_v56, %v1480_v61 }
 0x795   : > { %2788 = vtanh.f32 %v1483_v0 }
 0x79f   : > { %v2789_v13 = vpop.eup %2788 }
 0x7a0   : > { %v1486_v18 = vmul.f32 %v2789_v13, %v1485_v5 }
 0x7a2   : > { %v1488_v1 = vadd.f32 %v1487_v63, %v1486_v18 }
 0x7a4   : > { %1489 = vst [vmem:[%s3115_s26 + $0x6] sm:$0x1] %v1488_v1  ;;  %1557 = vmatmul.mubr.f32.vlgmr.msra.gmra.mrb[14].mxu0 %v1488_v1  ;;  %2205 = vmatmul.mubr.f32.vlgmr.msra.gmra.mrb[14].mxu1 %v1488_v1 }
 0x877   : > { %v1558_v6 = vpop.f32.mrb[14].mxu0  ;;  %v1629_v7 = vpop.f32.mrb[14].mxu1 }
 0x878   : > { %v1559_v14 = vadd.f32 %v1558_v6, %v3249_v26  ;;  %v1560_v12 = vpop.f32.mrb[15].mxu0  ;;  %v2206_v15 = vpop.f32.mrb[15].mxu1  ;;  %v1630_v26 = vadd.f32 %v1629_v7, %v3256_v50 }
 0x879   : > { %v1561_v19 = vadd.f32 %v1560_v12, %v3251_v27 }
 0x87a   : > { %v1633_v21 = vadd.f32 %v1784_v2, %v1559_v14 }
 0x87b   : > { %v1643_v25 = vadd.f32 %v1641_v20, %v1561_v19 }
 0x87c   : > { %v1785_v24 = vmul.f32 -1.442695, %v1633_v21 }
 0x87d   : > { %v1786_v28 = vmul.f32 -1.442695, %v1643_v25 }
 0x87e   : > { %2790 = vpow2.f32 %v1785_v24 }
 0x87f   : > { %2792 = vpow2.f32 %v1786_v28 }
 0x888   : > { %v2791_v29 = vpop.eup %2790 }
 0x889   : > { %v1637_v31 = vadd.f32 1.0, %v2791_v29  ;;  %v2793_v33 = vpop.eup %2792 }
 0x88a   : > { %v1647_v35 = vadd.f32 1.0, %v2793_v33 }
 0x88b   : > { %2794 = vrcp.f32 %v1637_v31 }
 0x88c   : > { %2796 = vrcp.f32 %v1647_v35 }
 0x895   : > { %v2795_v37 = vpop.eup %2794 }
 0x896   : > { %v1650_v27 = vmul.f32 %v2795_v37, %v1630_v26  ;;  %v2797_v40 = vpop.eup %2796 }
 0x897   : > { %v1655_v4 = vsub.f32 1.0, %v2797_v40  ;;  %v1657_v45 = vmul.f32 %v2797_v40, %v1488_v1 }
 0x898   : > { %v1653_v39 = vadd.f32 %v1651_v36, %v1650_v27 }
 0x89a   : > { %2798 = vtanh.f32 %v1653_v39 }
 0x8a4   : > { %v2799_v41 = vpop.eup %2798 }
 0x8a5   : > { %v1656_v44 = vmul.f32 %v2799_v41, %v1655_v4 }
 0x8a7   : > { %v1658_v46 = vadd.f32 %v1657_v45, %v1656_v44 }
 0x8a9   : > { %1659 = vst [vmem:[%s3115_s26 + $0x7] sm:$0x1] %v1658_v46  ;;  %1660 = vst [vmem:[#allocation2] sm:$0x1] %v1658_v46 }
 0x8aa   : > { %2871 = shalt.err (!%p2868_p10)
}
 0x8ab   : > { %s2872_s8 = scalar_lea.hbm %s3544_s7, 128  ;;  %s2876_s26 = scalar_lea.hbm %s3593_s4, 256 }
 0x8ac   : > { %p2873_p2 = scmp.ne.s32.totalorder %s3544_s7, %s2872_s8  ;;  %p2877_p13 = scmp.lt.u32.totalorder %s3544_s7, %s3593_s4 }
 0x8ad   : > { %p2878_p1 = scmp.lt.u32.totalorder %s2876_s26, %s2872_s8  ;;  %p2880_p6 = scmp.lt.u32.totalorder %s2872_s8, %s3544_s7 }
 0x8ae   : > { %p2874_p5 = pnand %p2873_p2, %p3055_p11 }
 0x8af   : > { %p2879_p4 = por %p2878_p1, %p2877_p13 }
 0x8b0   : > { %p2875_p0 = pneg %p2874_p5 }
 0x8b1   : > { %p2881_p8 = por %p2880_p6, %p2879_p4 }
 0x8b3   : > { %p2882_p9 = pnand %p2881_p8, %p2875_p0 }
 0x8b5   : > { %2885 = shalt.err (!%p2882_p9)
}
 0x8b6   : > { %2664 = dma.vmem_to_hbm [thread:$0]  (%p3055_p11), %s3546_s20, 128, %s3544_s7, %s1662_s25  }
 0x8b7 PF: > { %s1687_s21 = sand.u32 1, %s2916_s15   ;;  %p3609_p12 = scmp.ne.s32.totalorder %s3598_s22, 0 }
 0x8b8   : > { %p3610_p3 = scmp.ge.s32.totalorder %s2928_s18, 2  ;;  %s1688_s10 = scalar_lea.sflag [#allocation5], %s1687_s21 }
 0x8ba   : > { %p2675_p7 = pnand %p3610_p3, %p3609_p12 }
 0x8bc   : > { %2911 = dma.done.wait (!%p2675_p7), %s1688_s10, 128  }
 0x8bd   : > { %2913 = vsyncadd (!%p2675_p7), %s1688_s10, 4294967168  ;;  %p18_p10 = scmp.ge.s32.totalorder %s3020_s27, 4   ;;  %s3611_s15 = smov %s2920_s16 }
 0x8be   : > { %s3612_s16 = smov %s2924_s17  ;;  %s3613_s17 = smov %s3051_s24 }
 0x8bf   : > { %s3614_s18 = smov %s3020_s27  ;;  %20 = sbr.rel (!%p18_p10) target bundleno = 6 (0x6), region = 96 }
 0x8c6   :  { %1693 = vsyncpa [#allocation4], 1 }
 0x8c7   :  { %1695 = vsyncpa [#allocation4 + $0x1], 1 }
 0x8c8   :  { %1696 = vsyncpa [#allocation7], 1 }
 0x8c9   :  { %1697 = vsyncpa [#allocation5], 1 }
 0x8ca   :  { %1699 = vsyncpa [#allocation5 + $0x1], 1 }

</bundles_post_ra>
